<compile_context>
chip_gen: v7x
topology: tpu7x:2x2x1
jax: 0.10.0
libtpu: 0.0.40
codegen_flags: <defaults>
</compile_context>

<pallas_src>
import jax
import jax.numpy as jnp
import numpy as np
from jax import lax
from jax.experimental import pallas as pl
from jax.experimental.pallas import tpu as pltpu


def _bilinear_x2_matrix(n_in):
    """(2*n_in, n_in) matrix M so that M @ v == F.interpolate(v, scale_factor=2,
    mode='bilinear', align_corners=False) applied along one axis (PyTorch formula:
    src = (dst + 0.5) * 0.5 - 0.5, clamped at 0, linear blend of the two neighbors)."""
    n_out = 2 * n_in
    dst = np.arange(n_out, dtype=np.float64)
    src = np.maximum((dst + 0.5) * 0.5 - 0.5, 0.0)
    i0 = np.clip(np.floor(src).astype(np.int64), 0, n_in - 1)
    i1 = np.minimum(i0 + 1, n_in - 1)
    frac = src - i0
    m = np.zeros((n_out, n_in), dtype=np.float32)
    m[np.arange(n_out), i0] += (1.0 - frac).astype(np.float32)
    m[np.arange(n_out), i1] += frac.astype(np.float32)
    return m


def _upconv_kernel(x_ref, awp_ref, ahp_ref, w_ref, b_ref, o_ref):
    # x_ref  : (1, C*H, W)        one NCHW image with (C, H) folded (free wrapper reshape)
    # awp_ref: (W, Wp)            bilinear x2 along W, zero halo columns baked in
    # ahp_ref: (Hp+1, H)          bilinear x2 along H, zero halo rows + 1 zero slack row
    # w_ref  : (OCH, 9*C)         conv weights, tap-major (ky, kx, c)
    # b_ref  : (OCH, 1)           bias
    # o_ref  : (1, OCH, H2*W2)    lane-dense flattened output
    ch = x_ref.shape[1]
    wp = awp_ref.shape[1]
    hp_slack, h_in = ahp_ref.shape            # hp_slack = H2 + 3 (halo rows + slack)
    c = ch // h_in
    och = o_ref.shape[1]
    h2, w2 = hp_slack - 3, wp - 2
    length = h2 * wp                          # flat span covering every valid output pixel

    # ---- bilinear x2 upsample + zero halo as two MXU matmuls (no data relayouts) ----
    y1 = jnp.dot(x_ref[0], awp_ref[...],
                 preferred_element_type=jnp.float32)            # (C*H, Wp)
    y1 = y1.reshape(c, h_in, wp)                                # split major dim (cheap)
    ahb = jnp.broadcast_to(ahp_ref[...], (c, hp_slack, h_in))   # hoisted, single broadcast
    upp = lax.dot_general(                                      # (C, Hp+1, Wp), batch over C
        ahb, y1,
        dimension_numbers=(((2,), (1,)), ((0,), (0,))),
        preferred_element_type=jnp.float32)

    # ---- flatten the padded spatial grid: taps become contiguous lane offsets -------
    # The zero slack row baked into ahp_ref guarantees dy*wp+dx+length <= hp_slack*wp.
    flat = upp.reshape(c, hp_slack * wp)

    # ---- im2col once, single fused (OCH, 9C) x (9C, L) MXU matmul --------------------
    taps = [flat[:, dy * wp + dx: dy * wp + dx + length]
            for dy in range(3) for dx in range(3)]
    patch = jnp.concatenate(taps, axis=0)                       # (9C, L)
    acc = jnp.dot(w_ref[...], patch,
                  preferred_element_type=jnp.float32)           # (OCH, L), lane-dense
    acc = acc + b_ref[...]                                      # (OCH, 1) broadcast

    # ---- ELU (alpha = 1); exp goes to the EUP slot, essentially free here ------------
    out = jnp.where(acc > 0.0, acc, jnp.exp(jnp.minimum(acc, 0.0)) - 1.0)

    # ---- drop the 2 halo columns per padded-width row, store lane-dense -------------
    out = out.reshape(och, h2, wp)[:, :, :w2].reshape(1, och, h2 * w2)
    o_ref[...] = out.astype(o_ref.dtype)


def upconv_forward(x_nchw, weight, bias):
    """UpConv forward: bilinear x2 upsample -> Conv2d(ich, och, 3, 1, pad=1) -> ELU.

    x_nchw : (N, C, H, W)   float32
    weight : (OCH, C, 3, 3) float32 (PyTorch layout)
    bias   : (OCH,)         float32
    returns: (N, OCH, 2H, 2W) float32
    """
    N, C, H, W = x_nchw.shape
    OCH = weight.shape[0]
    H2, W2 = 2 * H, 2 * W
    Hp, Wp = H2 + 2, W2 + 2

    # Interpolation matrices with the conv's zero halo (and one slack row) baked in.
    a_h = _bilinear_x2_matrix(H)                       # (H2, H)
    a_w = _bilinear_x2_matrix(W)                       # (W2, W)
    a_hp = np.zeros((Hp + 1, H), np.float32)           # +1 zero slack row for im2col taps
    a_hp[1:H2 + 1, :] = a_h                            # zero top/bottom halo rows
    a_wp = np.zeros((W, Wp), np.float32)
    a_wp[:, 1:-1] = a_w.T                              # zero left/right halo columns
    a_hp = jnp.asarray(a_hp)
    a_wp = jnp.asarray(a_wp)

    # Conv weights as (OCH, 9C), tap-major (ky, kx, c) to match the in-kernel im2col.
    w_mat = jnp.transpose(weight, (0, 2, 3, 1)).reshape(OCH, 9 * C)
    b_mat = bias.reshape(OCH, 1)

    # NCHW kept as-is; only free reshapes on the wrapper side.
    x2d = x_nchw.reshape(N, C * H, W)

    out_flat = pl.pallas_call(
        _upconv_kernel,
        out_shape=jax.ShapeDtypeStruct((N, OCH, H2 * W2), x_nchw.dtype),
        grid_spec=pltpu.PrefetchScalarGridSpec(
            num_scalar_prefetch=0,
            grid=(N,),
            in_specs=[
                pl.BlockSpec((1, C * H, W), lambda n: (n, 0, 0)),
                pl.BlockSpec((W, Wp), lambda n: (0, 0)),
                pl.BlockSpec((Hp + 1, H), lambda n: (0, 0)),
                pl.BlockSpec((OCH, 9 * C), lambda n: (0, 0)),
                pl.BlockSpec((OCH, 1), lambda n: (0, 0)),
            ],
            out_specs=pl.BlockSpec((1, OCH, H2 * W2), lambda n: (n, 0, 0)),
        ),
        compiler_params=pltpu.CompilerParams(
            dimension_semantics=("parallel",)),   # N>=2 -> both v7x TensorCores busy
    )(x2d, a_wp, a_hp, w_mat, b_mat)

    return out_flat.reshape(N, OCH, H2, W2)


# ----------------------------- pure-JAX reference ------------------------------------

def _upsample_bilinear_x2_ref(x):
    """Matches PyTorch F.interpolate(scale_factor=2, mode='bilinear',
    align_corners=False) on an NCHW tensor (independent gather+lerp implementation)."""
    def up_axis(a, axis):
        n = a.shape[axis]
        dst = jnp.arange(2 * n, dtype=jnp.float32)
        src = jnp.maximum((dst + 0.5) * 0.5 - 0.5, 0.0)
        i0 = jnp.clip(jnp.floor(src).astype(jnp.int32), 0, n - 1)
        i1 = jnp.minimum(i0 + 1, n - 1)
        frac = src - i0.astype(jnp.float32)
        g0 = jnp.take(a, i0, axis=axis)
        g1 = jnp.take(a, i1, axis=axis)
        shape = [1] * a.ndim
        shape[axis] = 2 * n
        frac = frac.reshape(shape)
        return g0 * (1.0 - frac) + g1 * frac
    return up_axis(up_axis(x, 2), 3)


def _reference_forward(x_nchw, weight, bias):
    up = _upsample_bilinear_x2_ref(x_nchw)
    y = lax.conv_general_dilated(
        up, weight,
        window_strides=(1, 1),
        padding=((1, 1), (1, 1)),
        dimension_numbers=("NCHW", "OIHW", "NCHW"),
    )
    y = y + bias.reshape(1, -1, 1, 1)
    return jnp.where(y > 0.0, y, jnp.exp(jnp.minimum(y, 0.0)) - 1.0)


if __name__ == "__main__":
    key = jax.random.PRNGKey(0)
    k_x, k_w, k_b = jax.random.split(key, 3)

    N, ICH, OCH, H, W = 2, 4, 8, 16, 16

    x = jax.random.normal(k_x, (N, ICH, H, W), dtype=jnp.float32)
    # Deterministic synthetic Conv2d(ich=4, och=8, k=3) parameters.
    fan_in = ICH * 3 * 3
    bound = 1.0 / np.sqrt(fan_in)
    weight = jax.random.uniform(k_w, (OCH, ICH, 3, 3),
                                minval=-bound, maxval=bound, dtype=jnp.float32)
    bias = jax.random.uniform(k_b, (OCH,),
                              minval=-bound, maxval=bound, dtype=jnp.float32)

    out = jax.block_until_ready(upconv_forward(x, weight, bias))
    ref = jax.block_until_ready(_reference_forward(x, weight, bias))
    np.testing.assert_allclose(np.asarray(out), np.asarray(ref), rtol=1e-4, atol=1e-4)

    print("KERNEL_OK")
</pallas_src>

<mosaic_0001>
module attributes {stable_mosaic.version = 11 : i64} {
  func.func @_upconv_kernel(%arg0: i32, %arg1: memref<1x64x16xf32, #tpu.memory_space<vmem>>, %arg2: memref<16x34xf32, #tpu.memory_space<vmem>>, %arg3: memref<35x16xf32, #tpu.memory_space<vmem>>, %arg4: memref<8x36xf32, #tpu.memory_space<vmem>>, %arg5: memref<8x1xf32, #tpu.memory_space<vmem>>, %arg6: memref<1x8x1024xf32, #tpu.memory_space<vmem>>) attributes {dimension_semantics = [#tpu.dimension_semantics<parallel>], iteration_bounds = array<i64: 2>, scalar_prefetch = 0 : i64, scratch_operands = 0 : i64, tpu.core_type = #tpu.core_type<tc>, window_params = [{transform_indices = @transform_0, window_bounds = array<i64: 1, 64, 16>}, {pipeline_mode = #tpu.pipeline_mode<synchronous>, transform_indices = @transform_1, window_bounds = array<i64: 16, 34>}, {pipeline_mode = #tpu.pipeline_mode<synchronous>, transform_indices = @transform_2, window_bounds = array<i64: 35, 16>}, {pipeline_mode = #tpu.pipeline_mode<synchronous>, transform_indices = @transform_3, window_bounds = array<i64: 8, 36>}, {pipeline_mode = #tpu.pipeline_mode<synchronous>, transform_indices = @transform_4, window_bounds = array<i64: 8, 1>}, {transform_indices = @transform_5, window_bounds = array<i64: 1, 8, 1024>}]} {
    %c0 = arith.constant 0 : index
    %c0_0 = arith.constant 0 : index
    %c0_1 = arith.constant 0 : index
    %0 = vector.load %arg1[%c0, %c0_0, %c0_1] : memref<1x64x16xf32, #tpu.memory_space<vmem>>, vector<1x64x16xf32>
    %1 = vector.shape_cast %0 : vector<1x64x16xf32> to vector<64x16xf32>
    %c0_2 = arith.constant 0 : index
    %c0_3 = arith.constant 0 : index
    %2 = vector.load %arg2[%c0_2, %c0_3] : memref<16x34xf32, #tpu.memory_space<vmem>>, vector<16x34xf32>
    %cst = arith.constant dense<0.000000e+00> : vector<64x34xf32>
    %3 = tpu.matmul %1, %2, %cst {dimension_numbers = #tpu.dot_dimension_numbers<[1], [0], [0], [1], [0, 0, 1, 1], [], []>} : vector<64x16xf32>, vector<16x34xf32>, vector<64x34xf32> -> vector<64x34xf32>
    %4 = vector.shape_cast %3 : vector<64x34xf32> to vector<4x16x34xf32>
    %c0_4 = arith.constant 0 : index
    %c0_5 = arith.constant 0 : index
    %5 = vector.load %arg3[%c0_4, %c0_5] : memref<35x16xf32, #tpu.memory_space<vmem>>, vector<35x16xf32>
    %6 = vector.shape_cast %5 : vector<35x16xf32> to vector<1x35x16xf32>
    %7 = vector.broadcast %6 : vector<1x35x16xf32> to vector<4x35x16xf32>
    %cst_6 = arith.constant dense<0.000000e+00> : vector<4x35x34xf32>
    %8 = tpu.matmul %7, %4, %cst_6 {dimension_numbers = #tpu.dot_dimension_numbers<[2], [1], [1], [2], [0, 0, 0, 1, 1, 2], [0], [0]>} : vector<4x35x16xf32>, vector<4x16x34xf32>, vector<4x35x34xf32> -> vector<4x35x34xf32>
    %9 = vector.shape_cast %8 : vector<4x35x34xf32> to vector<4x1190xf32>
    %10 = vector.extract_strided_slice %9 {offsets = [0, 0], sizes = [4, 1088], strides = [1, 1]} : vector<4x1190xf32> to vector<4x1088xf32>
    %11 = vector.extract_strided_slice %9 {offsets = [0, 1], sizes = [4, 1088], strides = [1, 1]} : vector<4x1190xf32> to vector<4x1088xf32>
    %12 = vector.extract_strided_slice %9 {offsets = [0, 2], sizes = [4, 1088], strides = [1, 1]} : vector<4x1190xf32> to vector<4x1088xf32>
    %13 = vector.extract_strided_slice %9 {offsets = [0, 34], sizes = [4, 1088], strides = [1, 1]} : vector<4x1190xf32> to vector<4x1088xf32>
    %14 = vector.extract_strided_slice %9 {offsets = [0, 35], sizes = [4, 1088], strides = [1, 1]} : vector<4x1190xf32> to vector<4x1088xf32>
    %15 = vector.extract_strided_slice %9 {offsets = [0, 36], sizes = [4, 1088], strides = [1, 1]} : vector<4x1190xf32> to vector<4x1088xf32>
    %16 = vector.extract_strided_slice %9 {offsets = [0, 68], sizes = [4, 1088], strides = [1, 1]} : vector<4x1190xf32> to vector<4x1088xf32>
    %17 = vector.extract_strided_slice %9 {offsets = [0, 69], sizes = [4, 1088], strides = [1, 1]} : vector<4x1190xf32> to vector<4x1088xf32>
    %18 = vector.extract_strided_slice %9 {offsets = [0, 70], sizes = [4, 1088], strides = [1, 1]} : vector<4x1190xf32> to vector<4x1088xf32>
    %19 = tpu.concatenate %10, %11, %12, %13, %14, %15, %16, %17, %18 in 0 : vector<4x1088xf32>, vector<4x1088xf32>, vector<4x1088xf32>, vector<4x1088xf32>, vector<4x1088xf32>, vector<4x1088xf32>, vector<4x1088xf32>, vector<4x1088xf32>, vector<4x1088xf32> -> vector<36x1088xf32>
    %c0_7 = arith.constant 0 : index
    %c0_8 = arith.constant 0 : index
    %20 = vector.load %arg4[%c0_7, %c0_8] : memref<8x36xf32, #tpu.memory_space<vmem>>, vector<8x36xf32>
    %cst_9 = arith.constant dense<0.000000e+00> : vector<8x1088xf32>
    %21 = tpu.matmul %20, %19, %cst_9 {dimension_numbers = #tpu.dot_dimension_numbers<[1], [0], [0], [1], [0, 0, 1, 1], [], []>} : vector<8x36xf32>, vector<36x1088xf32>, vector<8x1088xf32> -> vector<8x1088xf32>
    %c0_10 = arith.constant 0 : index
    %c0_11 = arith.constant 0 : index
    %22 = vector.load %arg5[%c0_10, %c0_11] : memref<8x1xf32, #tpu.memory_space<vmem>>, vector<8x1xf32>
    %23 = vector.broadcast %22 : vector<8x1xf32> to vector<8x1088xf32>
    %24 = arith.addf %21, %23 : vector<8x1088xf32>
    %cst_12 = arith.constant 0.000000e+00 : f32
    %25 = vector.broadcast %cst_12 : f32 to vector<8x1088xf32>
    %26 = arith.cmpf ogt, %24, %25 : vector<8x1088xf32>
    %cst_13 = arith.constant 0.000000e+00 : f32
    %27 = vector.broadcast %cst_13 : f32 to vector<8x1088xf32>
    %28 = arith.minimumf %24, %27 : vector<8x1088xf32>
    %29 = math.exp %28 : vector<8x1088xf32>
    %cst_14 = arith.constant 1.000000e+00 : f32
    %30 = vector.broadcast %cst_14 : f32 to vector<8x1088xf32>
    %31 = arith.subf %29, %30 : vector<8x1088xf32>
    %32 = arith.select %26, %24, %31 : vector<8x1088xi1>, vector<8x1088xf32>
    %33 = vector.shape_cast %32 : vector<8x1088xf32> to vector<8x32x34xf32>
    %34 = vector.extract_strided_slice %33 {offsets = [0, 0, 0], sizes = [8, 32, 32], strides = [1, 1, 1]} : vector<8x32x34xf32> to vector<8x32x32xf32>
    %35 = vector.shape_cast %34 : vector<8x32x32xf32> to vector<1x8x1024xf32>
    %c0_15 = arith.constant 0 : index
    %c0_16 = arith.constant 0 : index
    %c0_17 = arith.constant 0 : index
    %36 = vector.load %arg6[%c0_15, %c0_16, %c0_17] : memref<1x8x1024xf32, #tpu.memory_space<vmem>>, vector<1x8x1024xf32>
    tpu.vector_store %arg6[%c0_15, %c0_16, %c0_17], %35 {strides = array<i32>} : memref<1x8x1024xf32, #tpu.memory_space<vmem>>, vector<1x8x1024xf32>,
    return
  }
  func.func @transform_0(%arg0: i32) -> (i32, i32, i32) {
    %c0_i32 = arith.constant 0 : i32
    %c0_i32_0 = arith.constant 0 : i32
    %c0_i32_1 = arith.constant 0 : i32
    return %arg0, %c0_i32, %c0_i32_0 : i32, i32, i32
  }
  func.func @transform_1(%arg0: i32) -> (i32, i32) {
    %c0_i32 = arith.constant 0 : i32
    %c0_i32_0 = arith.constant 0 : i32
    %c0_i32_1 = arith.constant 0 : i32
    return %c0_i32, %c0_i32_0 : i32, i32
  }
  func.func @transform_2(%arg0: i32) -> (i32, i32) {
    %c0_i32 = arith.constant 0 : i32
    %c0_i32_0 = arith.constant 0 : i32
    %c0_i32_1 = arith.constant 0 : i32
    return %c0_i32, %c0_i32_0 : i32, i32
  }
  func.func @transform_3(%arg0: i32) -> (i32, i32) {
    %c0_i32 = arith.constant 0 : i32
    %c0_i32_0 = arith.constant 0 : i32
    %c0_i32_1 = arith.constant 0 : i32
    return %c0_i32, %c0_i32_0 : i32, i32
  }
  func.func @transform_4(%arg0: i32) -> (i32, i32) {
    %c0_i32 = arith.constant 0 : i32
    %c0_i32_0 = arith.constant 0 : i32
    %c0_i32_1 = arith.constant 0 : i32
    return %c0_i32, %c0_i32_0 : i32, i32
  }
  func.func @transform_5(%arg0: i32) -> (i32, i32, i32) {
    %c0_i32 = arith.constant 0 : i32
    %c0_i32_0 = arith.constant 0 : i32
    %c0_i32_1 = arith.constant 0 : i32
    return %arg0, %c0_i32, %c0_i32_0 : i32, i32, i32
  }
}

</mosaic_0001>

<bundles_post_ra>
// kernel: tpu_custom_call.1
= control target key start
LH: loop header
LB: loop body
LE: loop exit
PB: predicated region body
PF: predicated region fallthrough
CT: control target
= control target key end

     0   :  { %10 = vsyncpa [#allocation3], 0  ;;  %s5388_s0 = inlined_call_operand.vmem [shape: f32[2,64,16], index: 0, kind: input, shape index: {}]   ;;  %s5389_s1 = inlined_call_operand.vmem [shape: f32[16,34], index: 1, kind: input, shape index: {}]   ;;  %s5390_s2 = inlined_call_operand.vmem [shape: f32[35,16], index: 2, kind: input, shape index: {}]   ;;  %s5391_s3 = inlined_call_operand.vmem [shape: f32[8,36], index: 3, kind: input, shape index: {}]   ;;  %s5392_s4 = inlined_call_operand.vmem [shape: f32[8,1], index: 4, kind: input, shape index: {}]   ;;  %s5393_s5 = inlined_call_operand.hbm [shape: f32[2,8,1024], index: 5, kind: output, shape index: {}]  }
   0x1   :  { %12 = vsyncpa [#allocation3 + $0x1], 0  ;;  %s4196_s18 = smov 0   ;;  %s4198_s19 = smov 0  }
   0x2   :  { %s4200_s20 = smov 0   ;;  %s4202_s21 = smov 0  }
   0x3 LB: > { %s4217_s22 = sadd.s32 4294967295, %s4091_s21   ;;  %s3454_s23 = sadd.s32 4294967294, %s4091_s21   ;;  %s4091_s21 = sphi %s4202_s21, %s5404_s21   ;;  %s4087_s20 = sphi %s4200_s20, %s5403_s20   ;;  %s4083_s19 = sphi %s4198_s19, %s5402_s19   ;;  %s4079_s18 = sphi %s4196_s18, %s5401_s18  }
   0x4   : > { %s4221_s24 = sadd.s32 1, %s4091_s21   ;;  %s135_s25 = sadd.s32 1, %s4087_s20 }
   0x5   : > { %s132_s26 = ssub.s32 %s4091_s21, %s4221_s24  ;;  %p145_p0 = scmp.ne.s32.totalorder %s4087_s20, %s4083_s19 }
   0x6   : > { %p133_p1 = scmp.eq.s32.totalorder %s132_s26, 0  ;;  %p146_p2 = scmp.eq.s32.totalorder %s4217_s22, 1 }
   0x7   : > { %p151_p3 = scmp.ne.s32.totalorder %s4083_s19, %s4079_s18  ;;  %p152_p4 = scmp.eq.s32.totalorder %s3454_s23, 1 }
   0x8   : > { %s4232_s27 = scalar_select %p133_p1, %s4087_s20, %s135_s25  }
   0x9   : > { %p4234_p5 = por %p146_p2, %p145_p0  ;;  %p4238_p6 = por %p152_p4, %p151_p3 }
   0xa   : > { %p3457_p7 = scmp.ge.s32.totalorder %s4091_s21, 1  ;;  %p190_p8 = scmp.lt.s32.totalorder %s4091_s21, 3 }
   0xc   : > { %p191_p9 = pnand %p3457_p7, %p190_p8 }
   0xd   : > { %v231_v0 = vld [vmem:[%s5389_s1] sm:$0xff] (!%p191_p9)  ;;  %v232_v1 = vld [vmem:[%s5389_s1 + $0x8] sm:$0xff] (!%p191_p9)  ;;  %p218_p10 = scmp.lt.s32.totalorder (!%p191_p9), %s4217_s22, 1  ;;  %vm233_vm0 = vcmask (!%p191_p9), 130048   ;;  %v5394_v11 = vmov (!%p191_p9), 0.0|0.0   ;;  %vm4094_vm1 = vmmov (!%p191_p9), 0   ;;  %v748_v46 = vlaneseq (!%p191_p9) }
   0xe   : > { %194 = sbr.rel (%p191_p9) target bundleno = 1403 (0x57b), region = 40  ;;  %v3700_v2 = vpack.c.bf16 (!%p191_p9), %v232_v1, %v231_v0  ;;  %3704 = vmatprep.subr.bf16.mxu1 (!%p191_p9), %v5394_v11  ;;  %v4095_v12 = vmov (!%p191_p9), 0.0   ;;  %v363_v17 = vld [vmem:[%s5390_s2] sm:$0xff] (!%p191_p9)  ;;  %v364_v20 = vld [vmem:[%s5390_s2 + $0x8] sm:$0xff] (!%p191_p9)  ;;  %v365_v24 = vld [vmem:[%s5390_s2 + $0x10] sm:$0xff] (!%p191_p9)  ;;  %s4098_s8 = smov (!%p191_p9), 76  }
   0xf   : > { %3615 = vmatprep.mubr.msk.f32.mxu1 (!%p191_p9), %vm4094_vm1, %v4095_v12  ;;  %v366_v28 = vld [vmem:[%s5390_s2 + $0x18] sm:$0xff] (!%p191_p9)  ;;  %v367_v29 = vld [vmem:[%s5390_s2 + $0x20] sm:$0x7] (!%p191_p9)  ;;  %v4096_v44 = vmov (!%p191_p9), 1983009808   ;;  %v749_v52 = vshrl.u32 (!%p191_p9), %v748_v46, 7 }
  0x10   : > { %3701 = vmatprep.subr.bf16.mxu0 (!%p191_p9), %v3700_v2  ;;  %v746_v45 = vunpack.c.l.s4 (!%p191_p9), %v4096_v44  ;;  %v4097_v53 = vmov (!%p191_p9), 1934713408   ;;  %s4101_s11 = smov (!%p191_p9), 102   ;;  %s4102_s12 = smov (!%p191_p9), 110   ;;  %vm1190_vm2 = vcmask (!%p191_p9), 64512   ;;  %vm1192_vm3 = vcmask (!%p191_p9), 343040  }
  0x11   : > { %3703 = vmatpush3.bf16.msra.mxu0 (!%p191_p9), %v3700_v2  ;;  %v778_v54 = vunpack.c.l.s4 (!%p191_p9), %v4097_v53  ;;  %s4104_s14 = smov (!%p191_p9), 16   ;;  %s4105_s15 = smov (!%p191_p9), 34   ;;  %vm1184_vm4 = vcmask (!%p191_p9), 277504   ;;  %vm1186_vm5 = vcmask (!%p191_p9), 556032   ;;  %vm1188_vm6 = vcmask (!%p191_p9), 834560  }
  0x12   : > { %3707 = vmatprep.subr.bf16.mxu0 (!%p191_p9), %v5394_v11  ;;  %v747_v51 = vunpack.c.0.s8 (!%p191_p9), %v746_v45  ;;  %s4106_s16 = smov (!%p191_p9), 24   ;;  %s4107_s17 = smov (!%p191_p9), 84   ;;  %vm1194_vm7 = vcmask (!%p191_p9), 621568   ;;  %vm1196_vm8 = vcmask (!%p191_p9), 900096   ;;  %vm1199_vm9 = vcmask (!%p191_p9), 408576  }
  0x13   : > { %v779_v62 = vunpack.c.0.s8 (!%p191_p9), %v778_v54  ;;  %s4108_s23 = smov (!%p191_p9), 92   ;;  %s4109_s25 = smov (!%p191_p9), 118   ;;  %vm1201_vm10 = vcmask (!%p191_p9), 687104   ;;  %vm1203_vm11 = vcmask (!%p191_p9), 965632   ;;  %vm1205_vm12 = vcmask (!%p191_p9), 195584  }
  0x14   : > { %v4356_v61 = vsub.s32 (!%p191_p9), %v747_v51, %v749_v52  ;;  %s4110_s26 = smov (!%p191_p9), 50   ;;  %s4111_s30 = smov (!%p191_p9), 58   ;;  %vm1207_vm13 = vcmask (!%p191_p9), 474112   ;;  %vm1209_vm14 = vcmask (!%p191_p9), 752640   ;;  %vm1211_vm15 = vcmask (!%p191_p9), 1031168  }
  0x15   : > { %s219_s9 = scalar_select %p218_p10, %s4217_s22, 1 }
  0x16   : > { %s4112_s6 = smov 126   ;;  %s4113_s7 = smov 32  }
  0x17   : > { %s3549_s10 = sshll.u32 %s219_s9, 6  ;;  %s4099_s9 = smov 8  }
  0x18   : > { %s222_s13 = scalar_lea.vmem %s5388_s0, %s3549_s10  ;;  %s4100_s10 = smov 68  }
  0x19   : > { %v223_v3 = vld [vmem:[%s222_s13] sm:$0xff]  ;;  %v224_v4 = vld [vmem:[%s222_s13 + $0x8] sm:$0xff]  ;;  %v225_v5 = vld [vmem:[%s222_s13 + $0x10] sm:$0xff] }
  0x1a   : > { %3599 = vmatprep.mubr.msk.f32.mxu0 %vm233_vm0, %v223_v3  ;;  %v226_v6 = vld [vmem:[%s222_s13 + $0x18] sm:$0xff]  ;;  %v227_v7 = vld [vmem:[%s222_s13 + $0x20] sm:$0xff]  ;;  %v228_v8 = vld [vmem:[%s222_s13 + $0x28] sm:$0xff] }
  0x1b   : > { %3600 = vmatmul.mubr.msk.f32.vlgmr.msra.gmra.mrb[0].mxu0 %vm233_vm0, %v224_v4  ;;  %v229_v9 = vld [vmem:[%s222_s13 + $0x30] sm:$0xff]  ;;  %v230_v10 = vld [vmem:[%s222_s13 + $0x38] sm:$0xff]  ;;  %s4103_s13 = smov 42  }
  0x1c   : > { %3602 = vmatprep.mubr.msk.f32.mxu0 %vm233_vm0, %v225_v5 }
  0x1f   : > { %3603 = vmatmul.mubr.msk.f32.gmra.mrb[2].mxu0 %vm233_vm0, %v226_v6 }
  0x20   : > { %3605 = vmatprep.mubr.msk.f32.mxu0 %vm233_vm0, %v227_v7 }
  0x23   : > { %3606 = vmatmul.mubr.msk.f32.gmra.mrb[4].mxu0 %vm233_vm0, %v228_v8 }
  0x24   : > { %3608 = vmatprep.mubr.msk.f32.mxu0 %vm233_vm0, %v229_v9 }
  0x27   : > { %3609 = vmatmul.mubr.msk.f32.gmra.mrb[6].mxu0 %vm233_vm0, %v230_v10  ;;  %v4365_v10 = vsub.s32 %v779_v62, %v749_v52 }
  0x28   : > { %3634 = vmatprep.mubr.msk.f32.mxu0 %vm4094_vm1, %v4095_v12 }
  0xee   : > { %v3601_v13 = vpop.f32.mrb[0].mxu0 }
  0xef   : > { %v324_v14 = vpop.f32.mrb[1].mxu0 }
  0xf0   : > { %v3705_v15 = vpack.c.bf16 %v3601_v13, %v324_v14 }
  0xf2   : > { %v3604_v16 = vpop.f32.mrb[2].mxu0  ;;  %3706 = vmatpush3.bf16.msra.mxu1 %v3705_v15 }
  0xf3   : > { %v334_v18 = vpop.f32.mrb[3].mxu0  ;;  %3710 = vmatprep.subr.bf16.mxu1 %v5394_v11 }
  0xf4   : > { %v3708_v19 = vpack.c.bf16 %v3604_v16, %v334_v18 }
  0xf5   : > { %3616 = vmatmul.mubr.msk.f32.vlgmr.msra.gmra.mrb[0].mxu1 %vm233_vm0, %v363_v17 }
  0xf6   : > { %3709 = vmatpush3.bf16.msra.mxu0 %v3708_v19  ;;  %3618 = vmatprep.mubr.msk.f32.mxu1 %vm4094_vm1, %v4095_v12  ;;  %v3607_v21 = vpop.f32.mrb[4].mxu0 }
  0xf7   : > { %v344_v22 = vpop.f32.mrb[5].mxu0  ;;  %3713 = vmatprep.subr.bf16.mxu0 %v5394_v11 }
  0xf8   : > { %v3711_v23 = vpack.c.bf16 %v3607_v21, %v344_v22 }
  0xf9   : > { %3619 = vmatmul.mubr.msk.f32.gmra.mrb[2].mxu1 %vm233_vm0, %v364_v20  ;;  %3635 = vmatmul.mubr.msk.f32.vlgmr.msra.gmra.mrb[8].mxu0 %vm233_vm0, %v363_v17 }
  0xfa   : > { %3621 = vmatprep.mubr.msk.f32.mxu1 %vm4094_vm1, %v4095_v12  ;;  %3637 = vmatprep.mubr.msk.f32.mxu0 %vm4094_vm1, %v4095_v12  ;;  %v3610_v25 = vpop.f32.mrb[6].mxu0 }
  0xfb   : > { %3712 = vmatpush3.bf16.msra.mxu1 %v3711_v23  ;;  %v354_v26 = vpop.f32.mrb[7].mxu0 }
  0xfc   : > { %v3714_v27 = vpack.c.bf16 %v3610_v25, %v354_v26 }
  0xfd   : > { %3622 = vmatmul.mubr.msk.f32.gmra.mrb[4].mxu1 %vm233_vm0, %v365_v24  ;;  %3638 = vmatmul.mubr.msk.f32.gmra.mrb[10].mxu0 %vm233_vm0, %v364_v20 }
  0xfe   : > { %3624 = vmatprep.mubr.msk.f32.mxu1 %vm4094_vm1, %v4095_v12  ;;  %3640 = vmatprep.mubr.msk.f32.mxu0 %vm4094_vm1, %v4095_v12 }
  0xff   : > { %3715 = vmatpush3.bf16.msra.mxu0 %v3714_v27 }
 0x101   : > { %3625 = vmatmul.mubr.msk.f32.gmra.mrb[6].mxu1 %vm233_vm0, %v366_v28  ;;  %3641 = vmatmul.mubr.msk.f32.gmra.mrb[12].mxu0 %vm233_vm0, %v365_v24 }
 0x102   : > { %3627 = vmatprep.mubr.msk.f32.mxu1 %vm4094_vm1, %v4095_v12  ;;  %3643 = vmatprep.mubr.msk.f32.mxu0 %vm4094_vm1, %v4095_v12 }
 0x105   : > { %3628 = vmatmul.mubr.msk.f32.gmra.mrb[8].mxu1 %vm233_vm0, %v367_v29  ;;  %3644 = vmatmul.mubr.msk.f32.gmra.mrb[14].mxu0 %vm233_vm0, %v366_v28 }
 0x106   : > { %3646 = vmatprep.mubr.msk.f32.mxu0 %vm4094_vm1, %v4095_v12  ;;  %3653 = vmatprep.mubr.msk.f32.mxu1 %vm4094_vm1, %v4095_v12 }
 0x109   : > { %3647 = vmatmul.mubr.msk.f32.gmra.mrb[16].mxu0 %vm233_vm0, %v367_v29  ;;  %3654 = vmatmul.mubr.msk.f32.vlgmr.msra.gmra.mrb[10].mxu1 %vm233_vm0, %v363_v17 }
 0x10a   : > { %3656 = vmatprep.mubr.msk.f32.mxu1 %vm4094_vm1, %v4095_v12  ;;  %3672 = vmatprep.mubr.msk.f32.mxu0 %vm4094_vm1, %v4095_v12 }
 0x10d   : > { %3657 = vmatmul.mubr.msk.f32.gmra.mrb[12].mxu1 %vm233_vm0, %v364_v20  ;;  %3673 = vmatmul.mubr.msk.f32.vlgmr.msra.gmra.mrb[18].mxu0 %vm233_vm0, %v363_v17 }
 0x10e   : > { %3659 = vmatprep.mubr.msk.f32.mxu1 %vm4094_vm1, %v4095_v12  ;;  %3675 = vmatprep.mubr.msk.f32.mxu0 %vm4094_vm1, %v4095_v12 }
 0x111   : > { %3660 = vmatmul.mubr.msk.f32.gmra.mrb[14].mxu1 %vm233_vm0, %v365_v24  ;;  %3676 = vmatmul.mubr.msk.f32.gmra.mrb[20].mxu0 %vm233_vm0, %v364_v20 }
 0x112   : > { %3662 = vmatprep.mubr.msk.f32.mxu1 %vm4094_vm1, %v4095_v12  ;;  %3678 = vmatprep.mubr.msk.f32.mxu0 %vm4094_vm1, %v4095_v12 }
 0x115   : > { %3663 = vmatmul.mubr.msk.f32.gmra.mrb[16].mxu1 %vm233_vm0, %v366_v28  ;;  %3679 = vmatmul.mubr.msk.f32.gmra.mrb[22].mxu0 %vm233_vm0, %v365_v24 }
 0x116   : > { %3665 = vmatprep.mubr.msk.f32.mxu1 %vm4094_vm1, %v4095_v12  ;;  %3681 = vmatprep.mubr.msk.f32.mxu0 %vm4094_vm1, %v4095_v12 }
 0x119   : > { %3666 = vmatmul.mubr.msk.f32.gmra.mrb[18].mxu1 %vm233_vm0, %v367_v29  ;;  %3682 = vmatmul.mubr.msk.f32.gmra.mrb[24].mxu0 %vm233_vm0, %v366_v28 }
 0x11a   : > { %3684 = vmatprep.mubr.msk.f32.mxu0 %vm4094_vm1, %v4095_v12  ;;  %1686 = vmatprep.mubr.f32.mxu1 %v4095_v12 }
 0x11d   : > { %3685 = vmatmul.mubr.msk.f32.gmra.mrb[26].mxu0 %vm233_vm0, %v367_v29 }
 0x11e   : > { %1828 = vmatprep.mubr.f32.mxu0 %v4095_v12 }
 0x1c8   : > { %v449_v30 = vpop.f32.mrb[0].mxu1 }
 0x1c9   : > { %v3617_v31 = vpop.f32.mrb[1].mxu1 }
 0x1cc   : > { %v539_v32 = vpop.f32.mrb[8].mxu0  ;;  %v454_v33 = vpop.f32.mrb[2].mxu1 }
 0x1cd   : > { %v3636_v34 = vpop.f32.mrb[9].mxu0  ;;  %v3620_v35 = vpop.f32.mrb[3].mxu1 }
 0x1d0   : > { %v544_v36 = vpop.f32.mrb[10].mxu0  ;;  %v4344_v37 = vpop.f32.mrb[4].mxu1 }
 0x1d1   : > { %v3639_v38 = vpop.f32.mrb[11].mxu0  ;;  %v3623_v39 = vpop.f32.mrb[5].mxu1 }
 0x1d4   : > { %v4346_v40 = vpop.f32.mrb[12].mxu0  ;;  %v4348_v41 = vpop.f32.mrb[6].mxu1 }
 0x1d5   : > { %v3642_v42 = vpop.f32.mrb[13].mxu0  ;;  %v3626_v43 = vpop.f32.mrb[7].mxu1 }
 0x1d8   : > { %v4350_v47 = vpop.f32.mrb[14].mxu0  ;;  %v4352_v48 = vpop.f32.mrb[8].mxu1 }
 0x1d9   : > { %v3645_v49 = vpop.f32.mrb[15].mxu0  ;;  %v3629_v50 = vpop.f32.mrb[9].mxu1 }
 0x1dc   : > { %v629_v55 = vpop.f32.mrb[10].mxu1  ;;  %v4354_v56 = vpop.f32.mrb[16].mxu0 }
 0x1dd   : > { %v743_v57 = vcombine.low %v449_v30, %v629_v55  ;;  %v744_v58 = vcombine.high %v449_v30, %v629_v55  ;;  %v3648_v59 = vpop.f32.mrb[17].mxu0  ;;  %v3655_v60 = vpop.f32.mrb[11].mxu1 }
 0x1df   : > { %v4359_v7 = vrot.slane %v743_v57, %v4356_v61  ;;  %v758_v13 = vrot.slane %v744_v58, %v4356_v61 }
 0x1e0   : > { %v634_v63 = vpop.f32.mrb[12].mxu1  ;;  %v719_v0 = vpop.f32.mrb[18].mxu0 }
 0x1e1   : > { %v811_v1 = vcombine.low %v454_v33, %v634_v63  ;;  %v812_v2 = vcombine.high %v454_v33, %v634_v63  ;;  %v759_v3 = vcombine.low %v539_v32, %v719_v0  ;;  %v760_v4 = vcombine.high %v539_v32, %v719_v0  ;;  %v3674_v5 = vpop.f32.mrb[19].mxu0  ;;  %v3658_v6 = vpop.f32.mrb[13].mxu1 }
 0x1e3   : > { %v4362_v8 = vrot.slane %v759_v3, %v4356_v61  ;;  %v774_v9 = vrot.slane %v760_v4, %v4356_v61  ;;  %v4375_v26 = vrot.slane %v811_v1, %v4356_v61  ;;  %v4378_v27 = vrot.slane %v812_v2, %v4356_v61 }
 0x1e4   : > { %v639_v14 = vpop.f32.mrb[14].mxu1  ;;  %v724_v15 = vpop.f32.mrb[20].mxu0 }
 0x1e5   : > { %v775_v16 = vcombine.low %v4359_v7, %v4362_v8  ;;  %v776_v17 = vcombine.high %v4359_v7, %v4362_v8  ;;  %v879_v18 = vcombine.low %v4344_v37, %v639_v14  ;;  %v880_v19 = vcombine.high %v4344_v37, %v639_v14  ;;  %v3661_v20 = vpop.f32.mrb[15].mxu1  ;;  %v3677_v21 = vpop.f32.mrb[21].mxu0 }
 0x1e6   : > { %v827_v22 = vcombine.low %v544_v36, %v724_v15  ;;  %v828_v23 = vcombine.high %v544_v36, %v724_v15  ;;  %v792_v24 = vcombine.high %v758_v13, %v774_v9  ;;  %v791_v25 = vcombine.low %v758_v13, %v774_v9 }
 0x1e7   : > { %v790_v28 = vrot.slane %v776_v17, %v4365_v10  ;;  %v4441_v7 = vrot.slane %v775_v16, %v4365_v10 }
 0x1e8   : > { %v4382_v29 = vrot.slane %v827_v22, %v4356_v61  ;;  %v4385_v30 = vrot.slane %v828_v23, %v4356_v61  ;;  %v644_v31 = vpop.f32.mrb[16].mxu1  ;;  %v729_v32 = vpop.f32.mrb[22].mxu0  ;;  %v806_v33 = vrot.slane %v792_v24, %v4365_v10  ;;  %v799_v34 = vrot.slane %v791_v25, %v4365_v10 }
 0x1e9   : > { %v947_v35 = vcombine.low %v4348_v41, %v644_v31  ;;  %v948_v36 = vcombine.high %v4348_v41, %v644_v31  ;;  %v895_v37 = vcombine.low %v4346_v40, %v729_v32  ;;  %v896_v38 = vcombine.high %v4346_v40, %v729_v32  ;;  %v3664_v39 = vpop.f32.mrb[17].mxu1  ;;  %v3680_v42 = vpop.f32.mrb[23].mxu0 }
 0x1ea   : > { %v843_v43 = vcombine.low %v4375_v26, %v4382_v29  ;;  %v844_v44 = vcombine.high %v4375_v26, %v4382_v29  ;;  %v859_v45 = vcombine.low %v4378_v27, %v4385_v30  ;;  %v860_v46 = vcombine.high %v4378_v27, %v4385_v30  ;;  %1069 = vrot.lane.b32.xlu1 %v806_v33, %s4098_s8  ;;  %s4114_s8 = smov 100  }
 0x1eb   : > { %v4402_v41 = vrot.slane %v879_v18, %v4356_v61  ;;  %v4405_v40 = vrot.slane %v880_v19, %v4356_v61  ;;  %v4408_v49 = vrot.slane %v895_v37, %v4356_v61  ;;  %v4411_v50 = vrot.slane %v896_v38, %v4356_v61  ;;  %1061 = vrot.lane.b32.xlu0 %v799_v34, %s4099_s9  ;;  %s4115_s9 = smov 6  }
 0x1ec   : > { %v649_v51 = vpop.f32.mrb[18].mxu1  ;;  %v734_v52 = vpop.f32.mrb[24].mxu0  ;;  %v808_v53 = vcombine.high %v790_v28, %v4095_v12  ;;  %v4426_v1 = vrot.slane %v947_v35, %v4356_v61  ;;  %v4429_v2 = vrot.slane %v948_v36, %v4356_v61  ;;  %v810_v3 = vcombine.high %v806_v33, %v4095_v12 }
 0x1ed   : > { %v911_v54 = vcombine.low %v4402_v41, %v4408_v49  ;;  %v912_v55 = vcombine.high %v4402_v41, %v4408_v49  ;;  %v927_v57 = vcombine.low %v4405_v40, %v4411_v50  ;;  %v928_v58 = vcombine.high %v4405_v40, %v4411_v50  ;;  %v3683_v59 = vpop.f32.mrb[25].mxu0  ;;  %v3667_v60 = vpop.f32.mrb[19].mxu1 }
 0x1ee   : > { %v1015_v62 = vcombine.low %v4352_v48, %v649_v51  ;;  %v963_v63 = vcombine.low %v4350_v47, %v734_v52  ;;  %v964_v0 = vcombine.high %v4350_v47, %v734_v52  ;;  %1053 = vrot.lane.b32.xlu1 %v790_v28, %s4100_s10  ;;  %v809_v47 = vcombine.high %v799_v34, %v4095_v12  ;;  %s4116_s10 = smov 108  }
 0x1ef   : > { %1057 = vrot.lane.b32.xlu0 %v808_v53, %s4101_s11  ;;  %v851_v17 = vrot.slane %v843_v43, %v4365_v10  ;;  %v807_v20 = vcombine.high %v4441_v7, %v4095_v12  ;;  %v867_v21 = vrot.slane %v859_v45, %v4365_v10  ;;  %v858_v22 = vrot.slane %v844_v44, %v4365_v10  ;;  %s4117_s11 = smov 14  }
 0x1f0   : > { %v4433_v4 = vrot.slane %v963_v63, %v4356_v61  ;;  %v4436_v48 = vrot.slane %v964_v0, %v4356_v61  ;;  %v739_v5 = vpop.f32.mrb[26].mxu0  ;;  %v874_v23 = vrot.slane %v860_v46, %v4365_v10  ;;  %v919_v28 = vrot.slane %v911_v54, %v4365_v10 }
 0x1f1   : > { %v1023_v6 = vcombine.low %v4354_v56, %v739_v5  ;;  %v3686_v8 = vpop.f32.mrb[27].mxu0  ;;  %v4452_v56 = vrot.slane %v1015_v62, %v4356_v61  ;;  %v876_v24 = vcombine.high %v858_v22, %v4095_v12  ;;  %v875_v25 = vcombine.high %v851_v17, %v4095_v12 }
 0x1f2   : > { %v979_v9 = vcombine.low %v4426_v1, %v4433_v4  ;;  %v980_v13 = vcombine.high %v4426_v1, %v4433_v4  ;;  %v995_v14 = vcombine.low %v4429_v2, %v4436_v48  ;;  %v996_v15 = vcombine.high %v4429_v2, %v4436_v48  ;;  %1073 = vrot.lane.b32.xlu1 %v810_v3, %s4102_s12  ;;  %s4118_s12 = smov 40  }
 0x1f3   : > { %v4455_v16 = vrot.slane %v1023_v6, %v4356_v61  ;;  %1065 = vrot.lane.b32.xlu0 %v809_v47, %s4103_s13  ;;  %v877_v26 = vcombine.high %v867_v21, %v4095_v12  ;;  %v878_v27 = vcombine.high %v874_v23, %v4095_v12  ;;  %v926_v29 = vrot.slane %v912_v55, %v4365_v10  ;;  %s4119_s13 = smov 66  }
 0x1f4   : > { %v942_v31 = vrot.slane %v928_v58, %v4365_v10  ;;  %v935_v33 = vrot.slane %v927_v57, %v4365_v10  ;;  %v943_v34 = vcombine.high %v919_v28, %v4095_v12  ;;  %v987_v36 = vrot.slane %v979_v9, %v4365_v10 }
 0x1f5   : > { %v1031_v18 = vcombine.low %v4452_v56, %v4455_v16  ;;  %v1032_v19 = vcombine.high %v4452_v56, %v4455_v16  ;;  %v944_v30 = vcombine.high %v926_v29, %v4095_v12  ;;  %v994_v37 = vrot.slane %v980_v13, %v4365_v10 }
 0x1f6   : > { %1077 = vrot.lane.b32.xlu1 %v851_v17, %s4104_s14  ;;  %v946_v32 = vcombine.high %v942_v31, %v4095_v12  ;;  %v945_v35 = vcombine.high %v935_v33, %v4095_v12  ;;  %s4120_s14 = smov 74   ;;  %v1010_v38 = vrot.slane %v996_v15, %v4365_v10  ;;  %v1003_v39 = vrot.slane %v995_v14, %v4365_v10 }
 0x1f7   : > { %1049 = vrot.lane.b32.xlu0 %v807_v20, %s4105_s15  ;;  %s4121_s15 = smov 48   ;;  %v1011_v42 = vcombine.high %v987_v36, %v4095_v12  ;;  %v1012_v44 = vcombine.high %v994_v37, %v4095_v12  ;;  %v1039_v45 = vrot.slane %v1031_v18, %v4365_v10  ;;  %v1047_v41 = vrot.slane %v1032_v19, %v4365_v10 }
 0x1f8   : > { %v1014_v43 = vcombine.high %v1010_v38, %v4095_v12  ;;  %v1013_v46 = vcombine.high %v1003_v39, %v4095_v12 }
 0x1f9   : > { %v1040_v40 = vcombine.high %v1039_v45, %v4095_v12 }
 0x1fa   : > { %1093 = vrot.lane.b32.xlu1 %v867_v21, %s4106_s16  ;;  %s4122_s16 = smov 116  }
 0x1fb   : > { %1085 = vrot.lane.b32.xlu0 %v858_v22, %s4107_s17  ;;  %s4123_s17 = smov 124  }
 0x1fe   : > { %1101 = vrot.lane.b32.xlu1 %v874_v23, %s4108_s23 }
 0x1ff   : > { %1089 = vrot.lane.b32.xlu0 %v876_v24, %s4109_s25  ;;  %s4124_s25 = smov 56  }
 0x202   : > { %1081 = vrot.lane.b32.xlu1 %v875_v25, %s4110_s26  ;;  %s4125_s26 = smov 82  }
 0x203   : > { %1097 = vrot.lane.b32.xlu0 %v877_v26, %s4111_s30 }
 0x206   : > { %1105 = vrot.lane.b32.xlu1 %v878_v27, %s4112_s6 }
 0x207   : > { %1109 = vrot.lane.b32.xlu0 %v919_v28, %s4113_s7 }
 0x20a   : > { %1117 = vrot.lane.b32.xlu1 %v926_v29, %s4114_s8  ;;  %s4126_s8 = smov 30  }
 0x20b   : > { %1121 = vrot.lane.b32.xlu0 %v944_v30, %s4115_s9  ;;  %s4127_s9 = smov 22  }
 0x20e   : > { %1133 = vrot.lane.b32.xlu1 %v942_v31, %s4116_s10  ;;  %s4128_s10 = smov 64  }
 0x20f   : > { %1137 = vrot.lane.b32.xlu0 %v946_v32, %s4117_s11  ;;  %s4129_s11 = smov 90  }
 0x212   : > { %1125 = vrot.lane.b32.xlu1 %v935_v33, %s4118_s12  ;;  %s4130_s12 = smov 4  }
 0x213   : > { %1113 = vrot.lane.b32.xlu0 %v943_v34, %s4119_s13  ;;  %s4131_s13 = smov 98  }
 0x216   : > { %1129 = vrot.lane.b32.xlu1 %v945_v35, %s4120_s14  ;;  %s4132_s14 = smov 93  }
 0x217   : > { %1141 = vrot.lane.b32.xlu0 %v987_v36, %s4121_s15  ;;  %s4133_s15 = smov 60  }
 0x21a   : > { %1149 = vrot.lane.b32.xlu1 %v994_v37, %s4122_s16  ;;  %s4134_s16 = smov 59  }
 0x21b   : > { %1165 = vrot.lane.b32.xlu0 %v1010_v38, %s4123_s17  ;;  %s4135_s17 = smov 127  }
 0x21e   : > { %1157 = vrot.lane.b32.xlu1 %v1003_v39, %s4124_s25  ;;  %s4136_s25 = smov 94  }
 0x21f   : > { %1145 = vrot.lane.b32.xlu0 %v1011_v42, %s4125_s26  ;;  %s4147_s26 = smov 20  }
 0x222   : > { %1169 = vrot.lane.b32.xlu1 %v1014_v43, %s4126_s8  ;;  %s4138_s8 = smov 26  }
 0x223   : > { %1153 = vrot.lane.b32.xlu0 %v1012_v44, %s4127_s9  ;;  %s4139_s9 = smov 18  }
 0x226   : > { %1173 = vrot.lane.b32.xlu1 %v1039_v45, %s4128_s10 }
 0x227   : > { %1161 = vrot.lane.b32.xlu0 %v1013_v46, %s4129_s11  ;;  %s4140_s11 = smov 120  }
 0x22a   : > { %1181 = vrot.lane.b32.xlu1 %v1047_v41, %s4130_s12 }
 0x22b   : > { %1177 = vrot.lane.b32.xlu0 %v1040_v40, %s4131_s13 }
 0x25c   : > { %v1070_v49 = vpop.permute.xlu1 %1069 }
 0x25d   : > { %v1062_v50 = vpop.permute.xlu0 %1061 }
 0x260   : > { %v1054_v51 = vpop.permute.xlu1 %1053 }
 0x261   : > { %v1058_v52 = vpop.permute.xlu0 %1057 }
 0x262   : > { %v1191_v57 = vsel %vm1190_vm2, %v1058_v52, %v1062_v50  ;;  %vm1221_vm2 = vcmask 326656  }
 0x264   : > { %v1074_v53 = vpop.permute.xlu1 %1073 }
 0x265   : > { %v1066_v54 = vpop.permute.xlu0 %1065 }
 0x266   : > { %v1193_v59 = vsel %vm1192_vm3, %v1191_v57, %v1066_v54  ;;  %vm1223_vm3 = vcmask 605184  }
 0x267   : > { %v1195_v1 = vsel %vm1194_vm7, %v1193_v59, %v1070_v49  ;;  %vm1217_vm7 = vcmask 818176  }
 0x268   : > { %v1078_v55 = vpop.permute.xlu1 %1077  ;;  %v4523_v3 = vsel %vm1196_vm8, %v1195_v1, %v1074_v53  ;;  %vm1235_vm8 = vcmask 179200  }
 0x269   : > { %v1050_v58 = vpop.permute.xlu0 %1049  ;;  %v1198_v5 = vsel %vm233_vm0, %v1074_v53, %v1078_v55  ;;  %v1261_v22 = vrot.slane %v4523_v3, 4  ;;  %vm1219_vm0 = vcmask 48128  }
 0x26a   : > { %v1185_v60 = vsel %vm1184_vm4, %v4441_v7, %v1050_v58  ;;  %vm1213_vm4 = vcmask 261120  }
 0x26b   : > { %v1187_v62 = vsel %vm1186_vm5, %v1185_v60, %v1054_v51  ;;  %vm1215_vm5 = vcmask 539648  }
 0x26c   : > { %v4519_v63 = vsel %vm1188_vm6, %v1187_v62, %v1058_v52  ;;  %v1094_v0 = vpop.permute.xlu1 %1093  ;;  %vm1225_vm6 = vcmask 883712  }
 0x26d   : > { %v1086_v2 = vpop.permute.xlu0 %1085  ;;  %1527 = vrot.lane.b32.xlu0 %v4519_v63, %s4111_s30  ;;  %v1260_v29 = vrot.slane %v4519_v63, 4 }
 0x270   : > { %v1102_v4 = vpop.permute.xlu1 %1101 }
 0x271   : > { %v1090_v48 = vpop.permute.xlu0 %1089  ;;  %1529 = vrot.lane.b32.xlu0 %v4523_v3, %s4111_s30 }
 0x272   : > { %v1206_v13 = vsel %vm1205_vm12, %v1090_v48, %v1094_v0  ;;  %vm1231_vm12 = vcmask 670720  }
 0x274   : > { %v1082_v47 = vpop.permute.xlu1 %1081 }
 0x275   : > { %v1098_v6 = vpop.permute.xlu0 %1097  ;;  %v1200_v7 = vsel %vm1199_vm9, %v1198_v5, %v1082_v47  ;;  %vm1227_vm9 = vcmask 113664  }
 0x276   : > { %v1202_v8 = vsel %vm1201_vm10, %v1200_v7, %v1086_v2  ;;  %v1208_v56 = vsel %vm1207_vm13, %v1206_v13, %v1098_v6  ;;  %vm1229_vm10 = vcmask 392192  }
 0x277   : > { %v4528_v9 = vsel %vm1203_vm11, %v1202_v8, %v1090_v48  ;;  %v1210_v17 = vsel %vm1209_vm14, %v1208_v56, %v1102_v4  ;;  %vm1237_vm11 = vcmask 457728  }
 0x278   : > { %v1106_v14 = vpop.permute.xlu1 %1105  ;;  %v3865_v15 = vpack.i.bf16 %v4528_v9, %v4523_v3  ;;  %v1262_v18 = vrot.slane %v4528_v9, 4 }
 0x279   : > { %v1110_v16 = vpop.permute.xlu0 %1109  ;;  %v4538_v19 = vsel %vm1211_vm15, %v1210_v17, %v1106_v14 }
 0x27a   : > { %3866 = vrot.lane.b32.xlu1 %v3865_v15, %s4112_s6  ;;  %3871 = vrot.lane.b32.xlu0 %v3865_v15, %s4132_s14  ;;  %v3905_v23 = vpack.i.bf16 %v1262_v18, %v1261_v22  ;;  %v3880_v24 = vpack.i.bf16 %v4538_v19, %v4519_v63  ;;  %v1263_v27 = vrot.slane %v4538_v19, 4  ;;  %v1214_v38 = vsel %vm1213_vm4, %v1106_v14, %v1110_v16 }
 0x27b   : > { %v4137_v18 = vmov 0  }
 0x27c   : > { %v1118_v20 = vpop.permute.xlu1 %1117  ;;  %v3915_v30 = vpack.i.bf16 %v1263_v27, %v1260_v29  ;;  %4010 = vset.pattern.permute.xlu0 %v4137_v18 }
 0x27d   : > { %v1122_v21 = vpop.permute.xlu0 %1121 }
 0x27e   : > { %1531 = vrot.lane.b32.xlu1 %v4528_v9, %s4111_s30  ;;  %3876 = vrot.lane.b32.xlu0 %v3865_v15, %s4133_s15  ;;  %v1220_v34 = vsel %vm1219_vm0, %v1118_v20, %v1122_v21  ;;  %vm1239_vm0 = vcmask 736256  }
 0x280   : > { %v1134_v26 = vpop.permute.xlu1 %1133 }
 0x281   : > { %v1138_v25 = vpop.permute.xlu0 %1137 }
 0x282   : > { %3906 = vrot.lane.b32.xlu1 %v3905_v23, %s4108_s23  ;;  %3881 = vrot.lane.b32.xlu0 %v3880_v24, %s4112_s6  ;;  %v1228_v53 = vsel %vm1227_vm9, %v1134_v26, %v1138_v25  ;;  %vm1394_vm9 = vcmask 760832  }
 0x284   : > { %v1126_v31 = vpop.permute.xlu1 %1125 }
 0x285   : > { %v1114_v28 = vpop.permute.xlu0 %1113  ;;  %v1222_v35 = vsel %vm1221_vm2, %v1220_v34, %v1126_v31  ;;  %vm1233_vm2 = vcmask 949248  }
 0x286   : > { %3911 = vrot.lane.b32.xlu1 %v3905_v23, %s4134_s16  ;;  %3886 = vrot.lane.b32.xlu0 %v3880_v24, %s4132_s14  ;;  %v1216_v39 = vsel %vm1215_vm5, %v1214_v38, %v1114_v28  ;;  %vm1243_vm5 = vcmask 244736  }
 0x287   : > { %v4564_v43 = vsel %vm1217_vm7, %v1216_v39, %v1118_v20  ;;  %vm1247_vm7 = vcmask 801792   ;;  %v1594_v20 = vld [vmem:[%s5392_s4] sm:$0xff] }
 0x288   : > { %v1130_v33 = vpop.permute.xlu1 %1129  ;;  %v1264_v46 = vrot.slane %v4564_v43, 4 }
 0x289   : > { %v1142_v32 = vpop.permute.xlu0 %1141  ;;  %v1224_v37 = vsel %vm1223_vm3, %v1222_v35, %v1130_v33  ;;  %vm1241_vm3 = vcmask 1014784  }
 0x28a   : > { %3916 = vrot.lane.b32.xlu1 %v3915_v30, %s4135_s17  ;;  %3891 = vrot.lane.b32.xlu0 %v3880_v24, %s4133_s15  ;;  %v4560_v42 = vsel %vm1225_vm6, %v1224_v37, %v1134_v26  ;;  %v1230_v55 = vsel %vm1229_vm10, %v1228_v53, %v1142_v32  ;;  %vm1245_vm6 = vcmask 523264   ;;  %vm1468_vm10 = vcmask 490496  }
 0x28b   : > { %v1265_v45 = vrot.slane %v4560_v42, 4  ;;  %v3935_v41 = vpack.i.bf16 %v4560_v42, %v4564_v43 }
 0x28c   : > { %v1150_v50 = vpop.permute.xlu1 %1149 }
 0x28d   : > { %v1166_v36 = vpop.permute.xlu0 %1165  ;;  %v3950_v40 = vpack.i.bf16 %v1265_v45, %v1264_v46 }
 0x28e   : > { %3921 = vrot.lane.b32.xlu1 %v3915_v30, %s4136_s25  ;;  %1533 = vrot.lane.b32.xlu0 %v4538_v19, %s4111_s30 }
 0x290   : > { %v1158_v54 = vpop.permute.xlu1 %1157 }
 0x291   : > { %v1146_v44 = vpop.permute.xlu0 %1145 }
 0x292   : > { %3926 = vrot.lane.b32.xlu1 %v3915_v30, %s4108_s23  ;;  %3896 = vrot.lane.b32.xlu0 %v3905_v23, %s4135_s17  ;;  %v1232_v58 = vsel %vm1231_vm12, %v1230_v55, %v1146_v44  ;;  %vm1287_vm12 = vcmask 1039360  }
 0x293   : > { %v4580_v60 = vsel %vm1233_vm2, %v1232_v58, %v1150_v50  ;;  %vm1556_vm2 = vcmask 1043456  }
 0x294   : > { %v1170_v0 = vpop.permute.xlu1 %1169  ;;  %v1266_v2 = vrot.slane %v4580_v60, 4 }
 0x295   : > { %v1154_v49 = vpop.permute.xlu0 %1153  ;;  %v1244_v47 = vsel %vm1243_vm5, %v1166_v36, %v1170_v0 }
 0x296   : > { %3931 = vrot.lane.b32.xlu1 %v3915_v30, %s4134_s16  ;;  %3901 = vrot.lane.b32.xlu0 %v3905_v23, %s4136_s25  ;;  %v1236_v51 = vsel %vm1235_vm8, %v1150_v50, %v1154_v49  ;;  %vm1249_vm8 = vcmask 31744  }
 0x297   : > { %v1238_v57 = vsel %vm1237_vm11, %v1236_v51, %v1158_v54  ;;  %vm1508_vm11 = vcmask 482304  }
 0x298   : > { %v1174_v48 = vpop.permute.xlu1 %1173 }
 0x299   : > { %v1162_v52 = vpop.permute.xlu0 %1161  ;;  %v1246_v6 = vsel %vm1245_vm6, %v1244_v47, %v1174_v48 }
 0x29a   : > { %1535 = vrot.lane.b32.xlu1 %v4564_v43, %s4111_s30  ;;  %1537 = vrot.lane.b32.xlu0 %v4560_v42, %s4111_s30  ;;  %v1240_v59 = vsel %vm1239_vm0, %v1238_v57, %v1162_v52  ;;  %vm1358_vm0 = vcmask 769024  }
 0x29b   : > { %v4582_v62 = vsel %vm1241_vm3, %v1240_v59, %v1166_v36  ;;  %vm1600_vm3 = vcmask 293888  }
 0x29c   : > { %v3975_v1 = vpack.i.bf16 %v4582_v62, %v4580_v60  ;;  %v1267_v4 = vrot.slane %v4582_v62, 4  ;;  %v1182_v13 = vpop.permute.xlu1 %1181 }
 0x29d   : > { %v1178_v5 = vpop.permute.xlu0 %1177 }
 0x29e   : > { %3936 = vrot.lane.b32.xlu1 %v3935_v41, %s4112_s6  ;;  %3951 = vrot.lane.b32.xlu0 %v3950_v40, %s4135_s17  ;;  %v3985_v7 = vpack.i.bf16 %v1267_v4, %v1266_v2  ;;  %v4596_v8 = vsel %vm1247_vm7, %v1246_v6, %v1178_v5  ;;  %v1250_v15 = vsel %vm1249_vm8, %v1178_v5, %v1182_v13 }
 0x29f   : > { %v1268_v14 = vrot.slane %v4596_v8, 4  ;;  %v4000_v56 = vpack.i.bf16 %v1250_v15, %v4596_v8  ;;  %v1487_v16 = vrot.slane %v1250_v15, 4 }
 0x2a1   : > { %v4005_v17 = vpack.i.bf16 %v1268_v14, %v1267_v4 }
 0x2a2   : > { %3941 = vrot.lane.b32.xlu1 %v3935_v41, %s4132_s14  ;;  %3956 = vrot.lane.b32.xlu0 %v3950_v40, %s4136_s25 }
 0x2a6   : > { %3946 = vrot.lane.b32.xlu1 %v3935_v41, %s4133_s15  ;;  %3961 = vrot.lane.b32.xlu0 %v3950_v40, %s4108_s23 }
 0x2aa   : > { %1539 = vrot.lane.b32.xlu1 %v4580_v60, %s4111_s30  ;;  %3966 = vrot.lane.b32.xlu0 %v3950_v40, %s4134_s16 }
 0x2ae   : > { %3976 = vrot.lane.b32.xlu1 %v3975_v1, %s4132_s14  ;;  %3971 = vrot.lane.b32.xlu0 %v3975_v1, %s4112_s6 }
 0x2b2   : > { %3981 = vrot.lane.b32.xlu1 %v3975_v1, %s4133_s15  ;;  %1500 = vrot.lane.b32.xlu0 %v1266_v2, %s4134_s16 }
 0x2b6   : > { %3986 = vrot.lane.b32.xlu1 %v3985_v7, %s4135_s17  ;;  %1321 = vrot.lane.b32.xlu0 %v4596_v8, %s4112_s6  ;;  %s4146_s6 = smov 96  }
 0x2ba   : > { %3991 = vrot.lane.b32.xlu1 %v3985_v7, %s4136_s25  ;;  %3996 = vrot.lane.b32.xlu0 %v3985_v7, %s4108_s23 }
 0x2be   : > { %1392 = vrot.lane.b32.xlu0 %v4596_v8, %s4132_s14  ;;  %1285 = vrot.lane.b32.xlu1 %v1268_v14, %s4135_s17  ;;  %s4141_s14 = smov 52   ;;  %s4144_s17 = smov 2  }
 0x2c2   : > { %4001 = vrot.lane.b32.xlu0 %v4000_v56, %s4133_s15  ;;  %1356 = vrot.lane.b32.xlu1 %v1268_v14, %s4136_s25 }
 0x2c6   : > { %1506 = vrot.lane.b32.xlu0 %v1487_v16, %s4134_s16  ;;  %1428 = vrot.lane.b32.xlu1 %v1268_v14, %s4108_s23  ;;  %s4148_s23 = smov 88  }
 0x2ca   : > { %1543 = vrot.lane.b32.xlu0 %v4596_v8, %s4111_s30  ;;  %4006 = vrot.lane.b32.xlu1 %v4005_v17, %s4134_s16  ;;  %s4142_s16 = smov 86  }
 0x2ce   : > { %1541 = vrot.lane.b32.xlu1 %v4582_v62, %s4111_s30  ;;  %1597 = vperm.xlu0 %4010, %v1594_v20  }
 0x2d2   : > { %1545 = vrot.lane.b32.xlu1 %v1250_v15, %s4111_s30  ;;  %s4149_s30 = smov 122  }
 0x2df   : > { %v4622_v21 = vpop.permute.xlu0 %1527 }
 0x2e3   : > { %v4624_v22 = vpop.permute.xlu0 %1529 }
 0x2ec   : > { %v4626_v23 = vpop.permute.xlu1 %3866  ;;  %v4628_v24 = vpop.permute.xlu0 %3871 }
 0x2ed   : > { %v3869_v35 = vunpack.i.h.bf16 %v4626_v23  ;;  %v3868_v36 = vunpack.i.l.bf16 %v4626_v23  ;;  %v3874_v52 = vunpack.i.h.bf16 %v4628_v24  ;;  %v3873_v54 = vunpack.i.l.bf16 %v4628_v24 }
 0x2ee   : > { %v1547_v23 = vsel %vm1207_vm13, %v4622_v21, %v4624_v22 }
 0x2ef   : > { %v1324_v59 = vsel %vm1211_vm15, %v3868_v36, %v3869_v35  ;;  %v1396_v11 = vsel %vm1394_vm9, %v3873_v54, %v3874_v52 }
 0x2f0   : > { %v4630_v25 = vpop.permute.xlu1 %1531  ;;  %v4632_v26 = vpop.permute.xlu0 %3876 }
 0x2f1   : > { %v3879_v45 = vunpack.i.h.bf16 %v4632_v26  ;;  %v3878_v46 = vunpack.i.l.bf16 %v4632_v26 }
 0x2f3   : > { %v1470_v7 = vsel %vm1468_vm10, %v3878_v46, %v3879_v45 }
 0x2f4   : > { %v4634_v27 = vpop.permute.xlu1 %3906  ;;  %v4636_v28 = vpop.permute.xlu0 %3881 }
 0x2f5   : > { %v5396_v40 = vunpack.i.h.bf16 %v4634_v27  ;;  %v3908_v49 = vunpack.i.l.bf16 %v4634_v27  ;;  %v3883_v50 = vunpack.i.l.bf16 %v4636_v28 }
 0x2f7   : > { %v1323_v5 = vsel %vm1211_vm15, %v3883_v50, %v3868_v36  ;;  %v1431_v6 = vsel %vm1209_vm14, %v3908_v49, %v5396_v40 }
 0x2f8   : > { %v4638_v29 = vpop.permute.xlu1 %3911  ;;  %v4640_v30 = vpop.permute.xlu0 %3886 }
 0x2f9   : > { %v3914_v37 = vunpack.i.h.bf16 %v4638_v29  ;;  %v3913_v38 = vunpack.i.l.bf16 %v4638_v29  ;;  %v3888_v13 = vunpack.i.l.bf16 %v4640_v30 }
 0x2fb   : > { %v1510_v0 = vsel %vm1508_vm11, %v3913_v38, %v3914_v37 }
 0x2fc   : > { %v4642_v31 = vpop.permute.xlu1 %3916  ;;  %v4644_v32 = vpop.permute.xlu0 %3891 }
 0x2fd   : > { %v3918_v53 = vunpack.i.l.bf16 %v4642_v31  ;;  %v3893_v14 = vunpack.i.l.bf16 %v4644_v32 }
 0x2ff   : > { %v1469_v40 = vsel %vm1468_vm10, %v3893_v14, %v3878_v46 }
 0x300   : > { %v4646_v33 = vpop.permute.xlu1 %3921  ;;  %v4648_v34 = vpop.permute.xlu0 %1533 }
 0x301   : > { %v3923_v55 = vunpack.i.l.bf16 %v4646_v33 }
 0x304   : > { %v4654_v39 = vpop.permute.xlu1 %3926  ;;  %v4656_v44 = vpop.permute.xlu0 %3896 }
 0x305   : > { %v3898_v41 = vunpack.i.l.bf16 %v4656_v44  ;;  %v3899_v51 = vunpack.i.h.bf16 %v4656_v44  ;;  %v3928_v15 = vunpack.i.l.bf16 %v4654_v39 }
 0x307   : > { %v1288_v1 = vsel %vm1287_vm12, %v3918_v53, %v3898_v41  ;;  %v1289_v47 = vsel %vm1287_vm12, %v3898_v41, %v3899_v51  ;;  %v1585_v41 = vsel %vm1556_vm2, %v1470_v7, %v1510_v0  ;;  %v3919_v7 = vunpack.i.h.bf16 %v4642_v31 }
 0x308   : > { %v4669_v57 = vpop.permute.xlu1 %3931  ;;  %v3902_v58 = vpop.permute.xlu0 %3901  ;;  %v1557_v20 = vsel %vm1556_vm2, %v4519_v63, %v1288_v1  ;;  %v1558_v53 = vsel %vm1556_vm2, %v4523_v3, %v1289_v47  ;;  %v1430_v63 = vsel %vm1209_vm14, %v3928_v15, %v3908_v49  ;;  %v1576_v1 = vsel %vm1556_vm2, %v1396_v11, %v1431_v6 }
 0x309   : > { %v3933_v2 = vunpack.i.l.bf16 %v4669_v57  ;;  %v3904_v4 = vunpack.i.h.bf16 %v3902_v58  ;;  %v3903_v48 = vunpack.i.l.bf16 %v3902_v58  ;;  %v3720_v3 = vpack.c.bf16 %v1585_v41, %v1576_v1 }
 0x30a   : > { %v3884_v49 = vunpack.i.h.bf16 %v4636_v28  ;;  %v3924_v11 = vunpack.i.h.bf16 %v4646_v33  ;;  %v1548_v28 = vsel %vm1207_vm13, %v4624_v22, %v4630_v25  ;;  %v3889_v1 = vunpack.i.h.bf16 %v4640_v30 }
 0x30b   : > { %v1359_v56 = vsel %vm1358_vm0, %v3923_v55, %v3903_v48  ;;  %v1360_v16 = vsel %vm1358_vm0, %v3903_v48, %v3904_v4  ;;  %v1509_v50 = vsel %vm1508_vm11, %v3933_v2, %v3913_v38  ;;  %v1395_v2 = vsel %vm1394_vm9, %v3888_v13, %v3873_v54 }
 0x30c   : > { %v4694_v17 = vpop.permute.xlu1 %1535  ;;  %v4696_v18 = vpop.permute.xlu0 %1537  ;;  %v1566_v36 = vsel %vm1556_vm2, %v1323_v5, %v1359_v56  ;;  %v1567_v55 = vsel %vm1556_vm2, %v1324_v59, %v1360_v16  ;;  %v1584_v59 = vsel %vm1556_vm2, %v1469_v40, %v1509_v50  ;;  %v1575_v46 = vsel %vm1556_vm2, %v1395_v2, %v1430_v63  ;;  %v4752_v16 = vld [vmem:[%s5391_s3] sm:$0xff] }
 0x30d   : > { %v3718_v58 = vpack.c.bf16 %v1566_v36, %v1557_v20  ;;  %v3716_v48 = vpack.c.bf16 %v1567_v55, %v1558_v53  ;;  %v3722_v6 = vpack.c.bf16 %v1584_v59, %v1575_v46  ;;  %v1361_v54 = vsel %vm1358_vm0, %v3904_v4, %v3924_v11 }
 0x30e   : > { %v1325_v31 = vsel %vm1211_vm15, %v3869_v35, %v3884_v49  ;;  %v1290_v4 = vsel %vm1287_vm12, %v3899_v51, %v3919_v7  ;;  %v3934_v36 = vunpack.i.h.bf16 %v4669_v57  ;;  %v3894_v53 = vunpack.i.h.bf16 %v4644_v32 }
 0x30f   : > { %3717 = vmatprep.subr.bf16.mxu1 %v3716_v48  ;;  %v1568_v20 = vsel %vm1556_vm2, %v1325_v31, %v1361_v54  ;;  %v1559_v22 = vsel %vm1556_vm2, %v4528_v9, %v1290_v4  ;;  %v3929_v55 = vunpack.i.h.bf16 %v4654_v39  ;;  %v5399_v59 = vunpack.i.h.bf16 %v4634_v27 }
 0x310   : > { %v4712_v0 = vpop.permute.xlu1 %3936  ;;  %v4714_v38 = vpop.permute.xlu0 %3951  ;;  %3719 = vmatpush1.bf16.msra.mxu1 %v3718_v58  ;;  %v3726_v58 = vpack.c.bf16 %v1568_v20, %v1559_v22  ;;  %v1511_v9 = vsel %vm1508_vm11, %v3914_v37, %v3934_v36  ;;  %v1550_v31 = vsel %vm1207_vm13, %v4648_v34, %v4694_v17 }
 0x311   : > { %v3953_v5 = vunpack.i.l.bf16 %v4714_v38  ;;  %3721 = vmatprep.subr.bf16.mxu1 %v3720_v3  ;;  %v3938_v47 = vunpack.i.l.bf16 %v4712_v0  ;;  %v1471_v3 = vsel %vm1468_vm10, %v3879_v45, %v3894_v53  ;;  %v1432_v2 = vsel %vm1209_vm14, %v5399_v59, %v3929_v55 }
 0x312   : > { %v1586_v27 = vsel %vm1556_vm2, %v1471_v3, %v1511_v9  ;;  %v1397_v45 = vsel %vm1394_vm9, %v3874_v52, %v3889_v1  ;;  %v3954_v4 = vunpack.i.h.bf16 %v4714_v38  ;;  %v3939_v52 = vunpack.i.h.bf16 %v4712_v0 }
 0x313   : > { %v1291_v33 = vsel %vm1287_vm12, %v3919_v7, %v3953_v5  ;;  %v1326_v15 = vsel %vm1211_vm15, %v3884_v49, %v3938_v47  ;;  %v1577_v7 = vsel %vm1556_vm2, %v1397_v45, %v1432_v2 }
 0x314   : > { %v4724_v14 = vpop.permute.xlu1 %3941  ;;  %v4726_v40 = vpop.permute.xlu0 %3956  ;;  %3723 = vmatpush1.bf16.msra.mxu1 %v3722_v6  ;;  %v1560_v41 = vsel %vm1556_vm2, %v4538_v19, %v1291_v33  ;;  %v3730_v54 = vpack.c.bf16 %v1586_v27, %v1577_v7 }
 0x315   : > { %v3958_v13 = vunpack.i.l.bf16 %v4726_v40  ;;  %3489 = vmatprep.subr.msk.mxu1 %vm1556_vm2, %v1548_v28  ;;  %v3943_v19 = vunpack.i.l.bf16 %v4724_v14  ;;  %v3959_v24 = vunpack.i.h.bf16 %v4726_v40 }
 0x317   : > { %v1362_v56 = vsel %vm1358_vm0, %v3924_v11, %v3958_v13  ;;  %v1398_v37 = vsel %vm1394_vm9, %v3889_v1, %v3943_v19  ;;  %v1363_v20 = vsel %vm1358_vm0, %v3958_v13, %v3959_v24 }
 0x318   : > { %v4757_v35 = vpop.permute.xlu1 %3946  ;;  %v4759_v44 = vpop.permute.xlu0 %3961  ;;  %v1569_v51 = vsel %vm1556_vm2, %v1326_v15, %v1362_v56  ;;  %3490 = vmatpush1.msk.msra.mxu1 %vm1556_vm2, %v1547_v23  ;;  %v1549_v15 = vsel %vm1207_vm13, %v4630_v25, %v4648_v34  ;;  %v1327_v25 = vsel %vm1211_vm15, %v3938_v47, %v3939_v52 }
 0x319   : > { %v3963_v50 = vunpack.i.l.bf16 %v4759_v44  ;;  %3491 = vmatmul.mubr.msk.f32.vlgmr.msra.gmra.mrb[20].mxu1 %vm1600_vm3, %v4752_v16  ;;  %v3724_v21 = vpack.c.bf16 %v1569_v51, %v1560_v41  ;;  %v3948_v57 = vunpack.i.l.bf16 %v4757_v35  ;;  %v1292_v51 = vsel %vm1287_vm12, %v3953_v5, %v3954_v4 }
 0x31a   : > { %1757 = vmatprep.mubr.f32.mxu1 %v4095_v12  ;;  %v3944_v5 = vunpack.i.h.bf16 %v4724_v14  ;;  %v3949_v40 = vunpack.i.h.bf16 %v4757_v35  ;;  %v1570_v0 = vsel %vm1556_vm2, %v1327_v25, %v1363_v20  ;;  %v3964_v47 = vunpack.i.h.bf16 %v4759_v44 }
 0x31b   : > { %3725 = vmatprep.subr.bf16.mxu1 %v3724_v21  ;;  %v1433_v39 = vsel %vm1209_vm14, %v3929_v55, %v3963_v50  ;;  %v1472_v29 = vsel %vm1468_vm10, %v3894_v53, %v3948_v57  ;;  %v1561_v53 = vsel %vm1556_vm2, %v4564_v43, %v1292_v51 }
 0x31c   : > { %v4777_v48 = vpop.permute.xlu1 %1539  ;;  %v4779_v63 = vpop.permute.xlu0 %3966  ;;  %3727 = vmatpush1.bf16.msra.mxu1 %v3726_v58  ;;  %v1578_v11 = vsel %vm1556_vm2, %v1398_v37, %v1433_v39  ;;  %v1473_v7 = vsel %vm1468_vm10, %v3948_v57, %v3949_v40  ;;  %v1399_v35 = vsel %vm1394_vm9, %v3943_v19, %v3944_v5 }
 0x31d   : > { %v3968_v32 = vunpack.i.l.bf16 %v4779_v63  ;;  %v3969_v41 = vunpack.i.h.bf16 %v4779_v63 }
 0x31f   : > { %v1512_v30 = vsel %vm1508_vm11, %v3934_v36, %v3968_v32  ;;  %v1513_v1 = vsel %vm1508_vm11, %v3968_v32, %v3969_v41 }
 0x320   : > { %v4802_v46 = vpop.permute.xlu1 %3976  ;;  %v4804_v49 = vpop.permute.xlu0 %3971  ;;  %v1587_v26 = vsel %vm1556_vm2, %v1472_v29, %v1512_v30 }
 0x321   : > { %v3728_v6 = vpack.c.bf16 %v1587_v26, %v1578_v11  ;;  %v3978_v21 = vunpack.i.l.bf16 %v4802_v46  ;;  %v3973_v34 = vunpack.i.l.bf16 %v4804_v49  ;;  %v3974_v39 = vunpack.i.h.bf16 %v4804_v49 }
 0x323   : > { %3729 = vmatprep.subr.bf16.mxu1 %v3728_v6  ;;  %v1400_v9 = vsel %vm1394_vm9, %v3944_v5, %v3978_v21  ;;  %v1328_v43 = vsel %vm1211_vm15, %v3939_v52, %v3973_v34  ;;  %v3734_v6 = vpack.c.bf16 %v1570_v0, %v1561_v53  ;;  %v1588_v52 = vsel %vm1556_vm2, %v1473_v7, %v1513_v1 }
 0x324   : > { %v4813_v28 = vpop.permute.xlu1 %3981  ;;  %v4815_v33 = vpop.permute.xlu0 %1500  ;;  %3731 = vmatpush1.bf16.msra.mxu1 %v3730_v54  ;;  %v1434_v54 = vsel %vm1209_vm14, %v3963_v50, %v3964_v47  ;;  %v1329_v57 = vsel %vm1211_vm15, %v3973_v34, %v3974_v39  ;;  %v1552_v5 = vsel %vm1207_vm13, %v4696_v18, %v4777_v48 }
 0x325   : > { %3492 = vmatprep.subr.msk.mxu1 %vm1556_vm2, %v1550_v31  ;;  %v3983_v38 = vunpack.i.l.bf16 %v4813_v28  ;;  %v1514_v27 = vsel %vm1508_vm11, %v3969_v41, %v4815_v33  ;;  %v1579_v51 = vsel %vm1556_vm2, %v1399_v35, %v1434_v54 }
 0x326   : > { %v3738_v41 = vpack.c.bf16 %v1588_v52, %v1579_v51 }
 0x327   : > { %v1474_v59 = vsel %vm1468_vm10, %v3949_v40, %v3983_v38  ;;  %v3979_v40 = vunpack.i.h.bf16 %v4802_v46  ;;  %v5400_v46 = vmov 0.0|0.0  }
 0x328   : > { %v3987_v56 = vpop.permute.xlu1 %3986  ;;  %v4827_v23 = vpop.permute.xlu0 %1321  ;;  %3493 = vmatpush1.msk.msra.mxu1 %vm1556_vm2, %v1549_v15 }
 0x329   : > { %v3988_v36 = vunpack.i.l.bf16 %v3987_v56  ;;  %3494 = vmatmul.mubr.msk.f32.vlgmr.msra.gmra.mrb[22].mxu1 %vm1600_vm3, %v4752_v16  ;;  %v3989_v32 = vunpack.i.h.bf16 %v3987_v56  ;;  %v1330_v50 = vsel %vm1211_vm15, %v3974_v39, %v4827_v23 }
 0x32a   : > { %1899 = vmatprep.mubr.f32.mxu1 %v4095_v12 }
 0x32b   : > { %v1293_v55 = vsel %vm1287_vm12, %v3954_v4, %v3988_v36  ;;  %v1294_v44 = vsel %vm1287_vm12, %v3988_v36, %v3989_v32 }
 0x32c   : > { %v3992_v13 = vpop.permute.xlu1 %3991  ;;  %v4848_v22 = vpop.permute.xlu0 %3996  ;;  %v1562_v37 = vsel %vm1556_vm2, %v4560_v42, %v1293_v55  ;;  %v1589_v42 = vsel %vm1556_vm2, %v1474_v59, %v1514_v27  ;;  %v1563_v34 = vsel %vm1556_vm2, %v4580_v60, %v1294_v44 }
 0x32d   : > { %v3993_v58 = vunpack.i.l.bf16 %v3992_v13  ;;  %v3998_v63 = vunpack.i.l.bf16 %v4848_v22  ;;  %v3994_v3 = vunpack.i.h.bf16 %v3992_v13  ;;  %v3984_v13 = vunpack.i.h.bf16 %v4813_v28 }
 0x32f   : > { %v1364_v2 = vsel %vm1358_vm0, %v3959_v24, %v3993_v58  ;;  %v1435_v29 = vsel %vm1209_vm14, %v3964_v47, %v3998_v63  ;;  %v1365_v31 = vsel %vm1358_vm0, %v3993_v58, %v3994_v3  ;;  %v1551_v58 = vsel %vm1207_vm13, %v4694_v17, %v4696_v18 }
 0x330   : > { %v1286_v30 = vpop.permute.xlu1 %1285  ;;  %v1571_v49 = vsel %vm1556_vm2, %v1328_v43, %v1364_v2  ;;  %v1580_v26 = vsel %vm1556_vm2, %v1400_v9, %v1435_v29  ;;  %v1393_v45 = vpop.permute.xlu0 %1392  ;;  %v1572_v20 = vsel %vm1556_vm2, %v1329_v57, %v1365_v31  ;;  %v1401_v9 = vsel %vm1394_vm9, %v3978_v21, %v3979_v40 }
 0x331   : > { %v3732_v11 = vpack.c.bf16 %v1571_v49, %v1562_v37  ;;  %v1295_v4 = vsel %vm1287_vm12, %v3989_v32, %v1286_v30  ;;  %v3736_v24 = vpack.c.bf16 %v1589_v42, %v1580_v26  ;;  %v3742_v0 = vpack.c.bf16 %v1572_v20, %v1563_v34 }
 0x332   : > { %v1564_v14 = vsel %vm1556_vm2, %v4582_v62, %v1295_v4  ;;  %v3999_v62 = vunpack.i.h.bf16 %v4848_v22  ;;  %v1565_v1 = vsel %vm1556_vm2, %v4596_v8, %v1286_v30  ;;  %v1402_v28 = vsel %vm1394_vm9, %v3979_v40, %v1393_v45 }
 0x333   : > { %3733 = vmatprep.subr.bf16.mxu0 %v3732_v11  ;;  %vm2042_vm12 = vcmask 211968  }
 0x334   : > { %v1357_v15 = vpop.permute.xlu1 %1356  ;;  %3735 = vmatpush1.bf16.msra.mxu0 %v3734_v6  ;;  %v4002_v25 = vpop.permute.xlu0 %4001  ;;  %v1436_v43 = vsel %vm1209_vm14, %v3998_v63, %v3999_v62 }
 0x335   : > { %v1366_v56 = vsel %vm1358_vm0, %v3994_v3, %v1357_v15  ;;  %3737 = vmatprep.subr.bf16.mxu0 %v3736_v24  ;;  %v1574_v47 = vsel %vm1556_vm2, %v4827_v23, %v1357_v15  ;;  %v4004_v60 = vunpack.i.h.bf16 %v4002_v25  ;;  %v4003_v55 = vunpack.i.l.bf16 %v4002_v25 }
 0x336   : > { %v1573_v19 = vsel %vm1556_vm2, %v1330_v50, %v1366_v56  ;;  %v1475_v23 = vsel %vm1468_vm10, %v3983_v38, %v3984_v13  ;;  %v3749_v39 = vpack.c.bf16 %v1574_v47, %v1565_v1  ;;  %v1581_v11 = vsel %vm1556_vm2, %v1401_v9, %v1436_v43 }
 0x337   : > { %v3740_v36 = vpack.c.bf16 %v1573_v19, %v1564_v14  ;;  %v1476_v21 = vsel %vm1468_vm10, %v3984_v13, %v4003_v55  ;;  %v1477_v38 = vsel %vm1468_vm10, %v4003_v55, %v4004_v60  ;;  %vm2107_vm0 = vcmask 228352  }
 0x338   : > { %v1429_v53 = vpop.permute.xlu1 %1428  ;;  %3739 = vmatpush1.bf16.msra.mxu0 %v3738_v41  ;;  %v1507_v18 = vpop.permute.xlu0 %1506 }
 0x339   : > { %3495 = vmatprep.subr.msk.mxu0 %vm1556_vm2, %v1552_v5  ;;  %3741 = vmatprep.subr.bf16.mxu1 %v3740_v36  ;;  %v1437_v17 = vsel %vm1209_vm14, %v3999_v62, %v1429_v53  ;;  %v1583_v22 = vsel %vm1556_vm2, %v1393_v45, %v1429_v53 }
 0x33a   : > { %3743 = vmatpush1.bf16.msra.mxu1 %v3742_v0  ;;  %v1582_v32 = vsel %vm1556_vm2, %v1402_v28, %v1437_v17 }
 0x33c   : > { %v4007_v3 = vpop.permute.xlu1 %4006  ;;  %3496 = vmatpush1.msk.msra.mxu0 %vm1556_vm2, %v1551_v58  ;;  %v1544_v6 = vpop.permute.xlu0 %1543 }
 0x33d   : > { %v4009_v8 = vunpack.i.h.bf16 %v4007_v3  ;;  %v4008_v59 = vunpack.i.l.bf16 %v4007_v3  ;;  %3497 = vmatmul.mubr.msk.f32.vlgmr.msra.gmra.mrb[28].mxu0 %vm1600_vm3, %v4752_v16  ;;  %3748 = vmatprep.subr.bf16.mxu0 %v5400_v46 }
 0x33e   : > { %3750 = vmatpush3.bf16.msra.mxu0 %v3749_v39  ;;  %3697 = vmatprep.mubr.msk.f32.mxu0 %vm4094_vm1, %v4095_v12 }
 0x33f   : > { %v1515_v63 = vsel %vm1508_vm11, %v4815_v33, %v4008_v59  ;;  %v1516_v2 = vsel %vm1508_vm11, %v4008_v59, %v4009_v8  ;;  %v1517_v29 = vsel %vm1508_vm11, %v4009_v8, %v1507_v18  ;;  %3751 = vmatprep.subr.bf16.mxu0 %v5400_v46 }
 0x340   : > { %v1542_v30 = vpop.permute.xlu1 %1541  ;;  %v1591_v37 = vsel %vm1556_vm2, %v1476_v21, %v1516_v2  ;;  %v1592_v49 = vsel %vm1556_vm2, %v1477_v38, %v1517_v29  ;;  %v1590_v26 = vsel %vm1556_vm2, %v1475_v23, %v1515_v63 }
 0x341   : > { %v3744_v27 = vpack.c.bf16 %v1591_v37, %v1582_v32  ;;  %v3752_v45 = vpack.c.bf16 %v1592_v49, %v1583_v22  ;;  %v3746_v33 = vpack.c.bf16 %v1590_v26, %v1581_v11  ;;  %v1554_v7 = vsel %vm1207_vm13, %v1542_v30, %v1544_v6 }
 0x342   : > { %v1553_v31 = vsel %vm1207_vm13, %v4777_v48, %v1542_v30 }
 0x343   : > { %3745 = vmatprep.subr.bf16.mxu1 %v3744_v27  ;;  %3753 = vmatpush3.bf16.msra.mxu0 %v3752_v45 }
 0x344   : > { %v1546_v54 = vpop.permute.xlu1 %1545  ;;  %3747 = vmatpush1.bf16.msra.mxu1 %v3746_v33  ;;  %3695 = vmatprep.subr.mxu0 %v4095_v12 }
 0x345   : > { %v1555_v42 = vsel %vm1207_vm13, %v1544_v6, %v1546_v54  ;;  %3498 = vmatprep.subr.msk.mxu1 %vm1556_vm2, %v1554_v7 }
 0x347   : > { %3696 = vmatpush3.msk.msra.mxu0 %vm1556_vm2, %v1555_v42 }
 0x348   : > { %3499 = vmatpush1.msk.msra.mxu1 %vm1556_vm2, %v1553_v31  ;;  %3698 = vmatmul.mubr.msk.f32.vlgmr.msra.gmra.mrb[30].mxu0 %vm1600_vm3, %v4752_v16  ;;  %vm2059_vm2 = vcmask 146432  }
 0x349   : > { %3500 = vmatmul.mubr.msk.f32.vlgmr.msra.gmra.mrb[24].mxu1 %vm1600_vm3, %v4752_v16  ;;  %vm2093_vm3 = vcmask 15360  }
 0x34d   : > { %v4956_v4 = vpop.permute.xlu0 %1597 }
 0x3ec   : > { %v1688_v12 = vpop.f32.mrb[20].mxu1 }
 0x3ed   : > { %v1689_v24 = vadd.f32 %v1688_v12, %v4956_v4  ;;  %v1690_v52 = vpop.f32.mrb[21].mxu1 }
 0x3ee   : > { %v1691_v35 = vadd.f32 %v1690_v52, %v4956_v4 }
 0x3ef   : > { %v1985_v57 = vmin.f32 %v1689_v24, 0.0  ;;  %vm1976_vm1 = vcmp.gt.f32.partialorder %v1689_v24, 0.0 }
 0x3f0   : > { %v1986_v48 = vmin.f32 %v1691_v35, 0.0  ;;  %vm1977_vm13 = vcmp.gt.f32.partialorder %v1691_v35, 0.0 }
 0x3f1   : > { %v1994_v44 = vmul.f32 1.442695, %v1985_v57 }
 0x3f2   : > { %v1996_v15 = vmul.f32 1.442695, %v1986_v48 }
 0x3f3   : > { %4011 = vpow2.f32 %v1994_v44 }
 0x3f4   : > { %4013 = vpow2.f32 %v1996_v15 }
 0x3fc   : > { %v1759_v50 = vpop.f32.mrb[22].mxu1 }
 0x3fd   : > { %v4012_v56 = vpop.eup %4011  ;;  %v1761_v51 = vpop.f32.mrb[23].mxu1  ;;  %v1760_v0 = vadd.f32 %v1759_v50, %v4956_v4 }
 0x3fe   : > { %v4014_v20 = vpop.eup %4013  ;;  %v3503_v16 = vadd.f32 -1.0, %v4012_v56  ;;  %v1762_v23 = vadd.f32 %v1761_v51, %v4956_v4 }
 0x3ff   : > { %v3504_v14 = vadd.f32 -1.0, %v4014_v20  ;;  %v1987_v47 = vmin.f32 %v1760_v0, 0.0  ;;  %vm1978_vm5 = vcmp.gt.f32.partialorder %v1760_v0, 0.0 }
 0x400   : > { %v4960_v19 = vsel %vm1976_vm1, %v1689_v24, %v3503_v16  ;;  %v1988_v43 = vmin.f32 %v1762_v23, 0.0  ;;  %vm1979_vm7 = vcmp.gt.f32.partialorder %v1762_v23, 0.0  ;;  %vm2076_vm1 = vcmask 80896  }
 0x401   : > { %2038 = vrot.lane.b32.xlu1 %v4960_v19, %s4138_s8  ;;  %2031 = vrot.lane.b32.xlu0 %v4960_v19, %s4136_s25  ;;  %v2022_v41 = vsel %vm1977_vm13, %v1691_v35, %v3504_v14  ;;  %v1998_v9 = vmul.f32 1.442695, %v1987_v47  ;;  %s4145_s25 = smov 62   ;;  %vm2124_vm13 = vcmask 162816  }
 0x402   : > { %v2000_v8 = vmul.f32 1.442695, %v1988_v43 }
 0x405   : > { %2034 = vrot.lane.b32.xlu1 %v4960_v19, %s4133_s15  ;;  %2055 = vrot.lane.b32.xlu0 %v2022_v41, %s4139_s9  ;;  %s4143_s15 = smov 28  }
 0x409   : > { %2040 = vrot.lane.b32.xlu1 %v2022_v41, %s4138_s8  ;;  %2045 = vrot.lane.b32.xlu0 %v2022_v41, %s4140_s11  ;;  %s4150_s8 = smov 10   ;;  %s4151_s11 = smov 54  }
 0x40d   : > { %2051 = vrot.lane.b32.xlu0 %v2022_v41, %s4141_s14  ;;  %2048 = vrot.lane.b32.xlu1 %v2022_v41, %s4142_s16  ;;  %s4152_s14 = smov 78   ;;  %s4153_s16 = smov 112  }
 0x410   : > { %v1830_v25 = vpop.f32.mrb[28].mxu0 }
 0x411   : > { %v1831_v36 = vadd.f32 %v1830_v25, %v4956_v4  ;;  %v1832_v34 = vpop.f32.mrb[29].mxu0 }
 0x412   : > { %v1833_v5 = vadd.f32 %v1832_v34, %v4956_v4 }
 0x413   : > { %v1989_v40 = vmin.f32 %v1831_v36, 0.0  ;;  %vm1980_vm14 = vcmp.gt.f32.partialorder %v1831_v36, 0.0 }
 0x414   : > { %v1990_v13 = vmin.f32 %v1833_v5, 0.0  ;;  %vm1981_vm15 = vcmp.gt.f32.partialorder %v1833_v5, 0.0 }
 0x415   : > { %v2002_v53 = vmul.f32 1.442695, %v1989_v40 }
 0x416   : > { %v2004_v62 = vmul.f32 1.442695, %v1990_v13 }
 0x417   : > { %4015 = vpow2.f32 %v2002_v53 }
 0x418   : > { %4017 = vpow2.f32 %v2004_v62 }
 0x419   : > { %4019 = vpow2.f32 %v1998_v9 }
 0x41a   : > { %4021 = vpow2.f32 %v2000_v8 }
 0x41b   : > { %v1972_v60 = vpop.f32.mrb[30].mxu0 }
 0x41c   : > { %v1901_v55 = vpop.f32.mrb[24].mxu1  ;;  %v3699_v58 = vpop.f32.mrb[31].mxu0  ;;  %v1973_v38 = vadd.f32 %v1972_v60, %v4956_v4 }
 0x41d   : > { %v1903_v1 = vpop.f32.mrb[25].mxu1  ;;  %v1902_v46 = vadd.f32 %v1901_v55, %v4956_v4 }
 0x41e   : > { %v1993_v2 = vmin.f32 %v1973_v38, 0.0  ;;  %v1904_v49 = vadd.f32 %v1903_v1, %v4956_v4  ;;  %vm1984_vm10 = vcmp.gt.f32.partialorder %v1973_v38, 0.0 }
 0x41f   : > { %v1991_v22 = vmin.f32 %v1902_v46, 0.0  ;;  %vm1982_vm9 = vcmp.gt.f32.partialorder %v1902_v46, 0.0 }
 0x420   : > { %v2010_v37 = vmul.f32 1.442695, %v1993_v2  ;;  %v1992_v27 = vmin.f32 %v1904_v49, 0.0  ;;  %vm1983_vm11 = vcmp.gt.f32.partialorder %v1904_v49, 0.0 }
 0x421   : > { %v4016_v39 = vpop.eup %4015  ;;  %v2006_v29 = vmul.f32 1.442695, %v1991_v22 }
 0x422   : > { %v3507_v3 = vadd.f32 -1.0, %v4016_v39  ;;  %v4018_v18 = vpop.eup %4017  ;;  %v2008_v11 = vmul.f32 1.442695, %v1992_v27 }
 0x423   : > { %v3508_v59 = vadd.f32 -1.0, %v4018_v18  ;;  %v4020_v21 = vpop.eup %4019  ;;  %4023 = vpow2.f32 %v2006_v29 }
 0x424   : > { %v2025_v17 = vsel %vm1980_vm14, %v1831_v36, %v3507_v3  ;;  %v3505_v63 = vadd.f32 -1.0, %v4020_v21  ;;  %v4022_v30 = vpop.eup %4021  ;;  %4025 = vpow2.f32 %v2010_v37  ;;  %vm2141_vm14 = vcmask 97280  }
 0x425   : > { %2103 = vrot.lane.b32.xlu0 %v2025_v17, %s4143_s15  ;;  %2091 = vrot.lane.b32.xlu1 %v2025_v17, %s4144_s17  ;;  %v2026_v28 = vsel %vm1981_vm15, %v1833_v5, %v3508_v59  ;;  %v3506_v26 = vadd.f32 -1.0, %v4022_v30  ;;  %4027 = vpow2.f32 %v2008_v11 }
 0x426   : > { %v2023_v32 = vsel %vm1978_vm5, %v1760_v0, %v3505_v63 }
 0x427   : > { %v2024_v45 = vsel %vm1979_vm7, %v1762_v23, %v3506_v26 }
 0x429   : > { %2099 = vrot.lane.b32.xlu0 %v2025_v17, %s4145_s25  ;;  %2096 = vrot.lane.b32.xlu1 %v2025_v17, %s4146_s6  ;;  %s4155_s25 = smov 44  }
 0x42d   : > { %2120 = vrot.lane.b32.xlu0 %v2026_v28, %s4147_s26  ;;  %2105 = vrot.lane.b32.xlu1 %v2026_v28, %s4143_s15  ;;  %v4024_v33 = vpop.eup %4023  ;;  %s4154_s15 = smov 104  }
 0x42e   : > { %v3509_v6 = vadd.f32 -1.0, %v4024_v33  ;;  %v4026_v7 = vpop.eup %4025 }
 0x42f   : > { %v3511_v42 = vadd.f32 -1.0, %v4026_v7  ;;  %v4028_v4 = vpop.eup %4027 }
 0x430   : > { %v2027_v54 = vsel %vm1982_vm9, %v1902_v46, %v3509_v6  ;;  %v3510_v12 = vadd.f32 -1.0, %v4028_v4 }
 0x431   : > { %2113 = vrot.lane.b32.xlu0 %v2026_v28, %s4148_s23  ;;  %2110 = vrot.lane.b32.xlu1 %v2026_v28, %s4149_s30  ;;  %s4156_s23 = smov 36   ;;  %v2029_v31 = vsel %vm1984_vm10, %v1973_v38, %v3511_v42  ;;  %s4159_s30 = smov 114  }
 0x432   : > { %v2028_v24 = vsel %vm1983_vm11, %v1904_v49, %v3510_v12 }
 0x435   : > { %2072 = vrot.lane.b32.xlu0 %v2023_v32, %s4150_s8  ;;  %2116 = vrot.lane.b32.xlu1 %v2026_v28, %s4151_s11  ;;  %s4160_s11 = smov 46  }
 0x439   : > { %2065 = vrot.lane.b32.xlu0 %v2023_v32, %s4152_s14  ;;  %2057 = vrot.lane.b32.xlu1 %v2023_v32, %s4139_s9  ;;  %s4157_s9 = smov 12   ;;  %s4162_s14 = smov 72  }
 0x43d   : > { %2089 = vrot.lane.b32.xlu0 %v2024_v45, %s4144_s17  ;;  %2062 = vrot.lane.b32.xlu1 %v2023_v32, %s4153_s16  ;;  %s4158_s17 = smov 70   ;;  %s4163_s16 = smov 106  }
 0x441   : > { %2079 = vrot.lane.b32.xlu0 %v2024_v45, %s4154_s15  ;;  %2068 = vrot.lane.b32.xlu1 %v2023_v32, %s4155_s25  ;;  %s4164_s15 = smov 38  }
 0x445   : > { %2085 = vrot.lane.b32.xlu0 %v2024_v45, %s4156_s23  ;;  %2074 = vrot.lane.b32.xlu1 %v2024_v45, %s4150_s8  ;;  %s4161_s8 = smov 80  }
 0x449   : > { %2137 = vrot.lane.b32.xlu0 %v2027_v54, %s4157_s9  ;;  %2082 = vrot.lane.b32.xlu1 %v2024_v45, %s4158_s17  ;;  %s4165_s17 = smov [#allocation2]  }
 0x44d   : > { %2127 = vrot.lane.b32.xlu0 %v2027_v54, %s4159_s30  ;;  %2156 = vrot.lane.b32.xlu1 %v2029_v31, %s4130_s12  ;;  %s4033_s30 = sshll.u32 %s4165_s17, 4  ;;  %s4034_s30 = int_to_ptr.vmem [resolvable:$false] %s4033_s30 }
 0x451   : > { %2133 = vrot.lane.b32.xlu0 %v2027_v54, %s4160_s11  ;;  %2122 = vrot.lane.b32.xlu1 %v2027_v54, %s4147_s26  ;;  %s4035_s11 = scalar_lea.vmem %s4034_s30, 2048 }
 0x455   : > { %2154 = vrot.lane.b32.xlu0 %v2028_v24, %s4130_s12  ;;  %2130 = vrot.lane.b32.xlu1 %v2027_v54, %s4161_s8  ;;  %s215_s12 = sand.u32 1, %s4083_s19  }
 0x459   : > { %2147 = vrot.lane.b32.xlu0 %v2028_v24, %s4162_s14  ;;  %2139 = vrot.lane.b32.xlu1 %v2028_v24, %s4157_s9 }
 0x45d   : > { %2160 = vrot.lane.b32.xlu0 %v2029_v31, %s4131_s13  ;;  %2144 = vrot.lane.b32.xlu1 %v2028_v24, %s4163_s16  ;;  %s3458_s13 = sshll.u32 %s215_s12, 6 }
 0x461   : > { %2150 = vrot.lane.b32.xlu1 %v2028_v24, %s4164_s15 }
 0x473   : > { %v2039_v52 = vpop.permute.xlu1 %2038  ;;  %v2032_v15 = vpop.permute.xlu0 %2031 }
 0x477   : > { %v2035_v35 = vpop.permute.xlu1 %2034  ;;  %v2056_v55 = vpop.permute.xlu0 %2055 }
 0x478   : > { %v2163_v57 = vcombine.low %v4960_v19, %v2035_v35  ;;  %v2164_v48 = vcombine.high %v4960_v19, %v2035_v35 }
 0x47a   : > { %v2171_v20 = vrot.slane %v2163_v57, %v4356_v61  ;;  %v2178_v16 = vrot.slane %v2164_v48, %v4356_v61 }
 0x47b   : > { %v2041_v44 = vpop.permute.xlu1 %2040  ;;  %v5004_v59 = vpop.permute.xlu0 %2045 }
 0x47c   : > { %v2043_v50 = vsel %vm2042_vm12, %v2039_v52, %v2041_v44 }
 0x47d   : > { %v2179_v56 = vcombine.low %v2032_v15, %v2043_v50  ;;  %v2180_v51 = vcombine.high %v2032_v15, %v2043_v50 }
 0x47f   : > { %v2187_v14 = vrot.slane %v2179_v56, %v4356_v61  ;;  %v2194_v41 = vrot.slane %v2180_v51, %v4356_v61  ;;  %v2052_v63 = vpop.permute.xlu0 %2051  ;;  %v2049_v2 = vpop.permute.xlu1 %2048 }
 0x481   : > { %v2227_v25 = vcombine.low %v2171_v20, %v2187_v14  ;;  %v2228_v36 = vcombine.high %v2171_v20, %v2187_v14  ;;  %v2243_v34 = vcombine.low %v2178_v16, %v2194_v41  ;;  %v2244_v5 = vcombine.high %v2178_v16, %v2194_v41 }
 0x482   : > { %v2195_v16 = vcombine.low %v5004_v59, %v2052_v63 }
 0x483   : > { %v2235_v40 = vrot.slane %v2227_v25, %v4365_v10  ;;  %v2242_v19 = vrot.slane %v2228_v36, %v4365_v10  ;;  %v2251_v13 = vrot.slane %v2243_v34, %v4365_v10  ;;  %v2258_v53 = vrot.slane %v2244_v5, %v4365_v10 }
 0x485   : > { %v3512_v0 = vcombine.low %v2235_v40, %v2242_v19  ;;  %v3514_v62 = vcombine.high %v2235_v40, %v2242_v19  ;;  %v3516_v47 = vcombine.low %v2251_v13, %v2258_v53  ;;  %v3518_v60 = vcombine.high %v2251_v13, %v2258_v53 }
 0x486   : > { %v2196_v40 = vcombine.high %v5004_v59, %v2052_v63 }
 0x487   : > { %v2715_v58 = vrot.slane %v3512_v0, %v4356_v61  ;;  %v2731_v1 = vrot.slane %v3514_v62, %v4356_v61  ;;  %v2747_v9 = vrot.slane %v3516_v47, %v4356_v61  ;;  %v2763_v23 = vrot.slane %v3518_v60, %v4356_v61 }
 0x489   : > { %v2771_v39 = vcombine.low %v2715_v58, %v2731_v1  ;;  %v2803_v3 = vcombine.low %v2747_v9, %v2763_v23  ;;  %v2772_v43 = vcombine.high %v2715_v58, %v2731_v1  ;;  %v2804_v17 = vcombine.high %v2747_v9, %v2763_v23 }
 0x48a   : > { %v2203_v9 = vrot.slane %v2195_v16, %v4356_v61 }
 0x48b   : > { %v4999_v18 = vrot.slane %v2771_v39, %v4365_v10  ;;  %v5002_v8 = vrot.slane %v2803_v3, %v4365_v10  ;;  %v2786_v28 = vrot.slane %v2772_v43, %v4365_v10  ;;  %v2818_v21 = vrot.slane %v2804_v17, %v4365_v10 }
 0x48d   : > { %v2836_v46 = vcombine.high %v4999_v18, %v5002_v8  ;;  %v2835_v38 = vcombine.low %v4999_v18, %v5002_v8  ;;  %v2837_v22 = vcombine.low %v2786_v28, %v2818_v21  ;;  %v2838_v29 = vcombine.high %v2786_v28, %v2818_v21 }
 0x48f   : > { %3252 = vrot.lane.b32.xlu1 %v2836_v46, %s4113_s7 }
 0x493   : > { %3256 = vrot.lane.b32.xlu1 %v2837_v22, %s4128_s10 }
 0x497   : > { %v2104_v32 = vpop.permute.xlu0 %2103  ;;  %v2092_v30 = vpop.permute.xlu1 %2091  ;;  %3260 = vrot.lane.b32.xlu1 %v2838_v29, %s4146_s6 }
 0x49b   : > { %v2100_v37 = vpop.permute.xlu0 %2099  ;;  %v2097_v49 = vpop.permute.xlu1 %2096 }
 0x49f   : > { %v5015_v26 = vpop.permute.xlu0 %2120  ;;  %v2106_v27 = vpop.permute.xlu1 %2105 }
 0x4a0   : > { %v2108_v45 = vsel %vm2107_vm0, %v2104_v32, %v2106_v27 }
 0x4a1   : > { %v2435_v11 = vcombine.low %v2097_v49, %v2108_v45  ;;  %v2436_v33 = vcombine.high %v2097_v49, %v2108_v45 }
 0x4a3   : > { %v5017_v6 = vpop.permute.xlu0 %2113  ;;  %v2111_v7 = vpop.permute.xlu1 %2110  ;;  %v2443_v31 = vrot.slane %v2435_v11, %v4356_v61  ;;  %v2450_v4 = vrot.slane %v2436_v33, %v4356_v61 }
 0x4a4   : > { %v2451_v54 = vcombine.low %v2100_v37, %v2111_v7  ;;  %v2452_v42 = vcombine.high %v2100_v37, %v2111_v7 }
 0x4a6   : > { %v2459_v12 = vrot.slane %v2451_v54, %v4356_v61  ;;  %v2466_v24 = vrot.slane %v2452_v42, %v4356_v61 }
 0x4a7   : > { %v5023_v52 = vpop.permute.xlu0 %2072  ;;  %v5025_v35 = vpop.permute.xlu1 %2116 }
 0x4a8   : > { %v2499_v57 = vcombine.low %v2443_v31, %v2459_v12  ;;  %v2500_v48 = vcombine.high %v2443_v31, %v2459_v12  ;;  %v2515_v44 = vcombine.low %v2450_v4, %v2466_v24  ;;  %v2516_v15 = vcombine.high %v2450_v4, %v2466_v24 }
 0x4aa   : > { %v2507_v50 = vrot.slane %v2499_v57, %v4365_v10  ;;  %v2514_v56 = vrot.slane %v2500_v48, %v4365_v10  ;;  %v2523_v51 = vrot.slane %v2515_v44, %v4365_v10  ;;  %v2530_v20 = vrot.slane %v2516_v15, %v4365_v10 }
 0x4ab   : > { %v5032_v14 = vpop.permute.xlu0 %2065  ;;  %v2058_v41 = vpop.permute.xlu1 %2057 }
 0x4ac   : > { %v3528_v25 = vcombine.low %v2507_v50, %v2514_v56  ;;  %v3530_v36 = vcombine.high %v2507_v50, %v2514_v56  ;;  %v3532_v34 = vcombine.low %v2523_v51, %v2530_v20  ;;  %v3534_v5 = vcombine.high %v2523_v51, %v2530_v20 }
 0x4ad   : > { %v2060_v19 = vsel %vm2059_vm2, %v2056_v55, %v2058_v41  ;;  %v2210_v55 = vrot.slane %v2196_v40, %v4356_v61 }
 0x4ae   : > { %v2987_v13 = vrot.slane %v3528_v25, %v4356_v61  ;;  %v3003_v53 = vrot.slane %v3530_v36, %v4356_v61  ;;  %v3019_v0 = vrot.slane %v3532_v34, %v4356_v61  ;;  %v3035_v62 = vrot.slane %v3534_v5, %v4356_v61 }
 0x4af   : > { %v2211_v47 = vcombine.low %v2049_v2, %v2060_v19  ;;  %v2212_v60 = vcombine.high %v2049_v2, %v2060_v19  ;;  %v2090_v58 = vpop.permute.xlu0 %2089  ;;  %v2063_v1 = vpop.permute.xlu1 %2062 }
 0x4b0   : > { %v3043_v23 = vcombine.low %v2987_v13, %v3003_v53  ;;  %v3075_v39 = vcombine.low %v3019_v0, %v3035_v62  ;;  %v3044_v3 = vcombine.high %v2987_v13, %v3003_v53  ;;  %v3076_v59 = vcombine.high %v3019_v0, %v3035_v62 }
 0x4b1   : > { %v2219_v43 = vrot.slane %v2211_v47, %v4356_v61  ;;  %v2226_v17 = vrot.slane %v2212_v60, %v4356_v61  ;;  %v5043_v46 = vsel %vm2093_vm3, %v2090_v58, %v2092_v30 }
 0x4b2   : > { %v5046_v28 = vrot.slane %v3043_v23, %v4365_v10  ;;  %v5049_v21 = vrot.slane %v3075_v39, %v4365_v10  ;;  %v3058_v22 = vrot.slane %v3044_v3, %v4365_v10  ;;  %v3090_v11 = vrot.slane %v3076_v59, %v4365_v10 }
 0x4b3   : > { %v2259_v63 = vcombine.low %v2203_v9, %v2219_v43  ;;  %v2260_v2 = vcombine.high %v2203_v9, %v2219_v43  ;;  %v2275_v29 = vcombine.low %v2210_v55, %v2226_v17  ;;  %v2276_v32 = vcombine.high %v2210_v55, %v2226_v17  ;;  %v2080_v37 = vpop.permute.xlu0 %2079  ;;  %v2069_v49 = vpop.permute.xlu1 %2068 }
 0x4b4   : > { %v2299_v27 = vcombine.low %v2063_v1, %v2069_v49  ;;  %v2300_v45 = vcombine.high %v2063_v1, %v2069_v49  ;;  %v3108_v30 = vcombine.high %v5046_v28, %v5049_v21  ;;  %v3109_v12 = vcombine.low %v3058_v22, %v3090_v11 }
 0x4b5   : > { %v2267_v33 = vrot.slane %v2259_v63, %v4365_v10  ;;  %v2274_v7 = vrot.slane %v2260_v2, %v4365_v10  ;;  %v2283_v54 = vrot.slane %v2275_v29, %v4365_v10  ;;  %v2290_v42 = vrot.slane %v2276_v32, %v4365_v10 }
 0x4b6   : > { %v2307_v31 = vrot.slane %v2299_v27, %v4356_v61  ;;  %v2314_v4 = vrot.slane %v2300_v45, %v4356_v61  ;;  %3300 = vrot.lane.b32.xlu1 %v3108_v30, %s4113_s7  ;;  %v3110_v24 = vcombine.high %v3058_v22, %v3090_v11  ;;  %v3107_v41 = vcombine.low %v5046_v28, %v5049_v21 }
 0x4b7   : > { %v3513_v57 = vcombine.low %v2267_v33, %v2274_v7  ;;  %v3515_v48 = vcombine.high %v2267_v33, %v2274_v7  ;;  %v3517_v44 = vcombine.low %v2283_v54, %v2290_v42  ;;  %v3519_v15 = vcombine.high %v2283_v54, %v2290_v42  ;;  %v2086_v50 = vpop.permute.xlu0 %2085  ;;  %v2075_v56 = vpop.permute.xlu1 %2074 }
 0x4b8   : > { %v2331_v51 = vcombine.low %v2080_v37, %v2086_v50  ;;  %v2332_v20 = vcombine.high %v2080_v37, %v2086_v50  ;;  %v2077_v16 = vsel %vm2076_vm1, %v5023_v52, %v2075_v56 }
 0x4b9   : > { %v2722_v25 = vrot.slane %v3513_v57, %v4356_v61  ;;  %v2738_v36 = vrot.slane %v3515_v48, %v4356_v61  ;;  %v2754_v34 = vrot.slane %v3517_v44, %v4356_v61  ;;  %v2770_v5 = vrot.slane %v3519_v15, %v4356_v61 }
 0x4ba   : > { %v2339_v40 = vrot.slane %v2331_v51, %v4356_v61  ;;  %v2346_v19 = vrot.slane %v2332_v20, %v4356_v61  ;;  %v2315_v13 = vcombine.low %v5032_v14, %v2077_v16  ;;  %v2316_v53 = vcombine.high %v5032_v14, %v2077_v16  ;;  %3304 = vrot.lane.b32.xlu1 %v3109_v12, %s4128_s10 }
 0x4bb   : > { %v5075_v52 = vpop.permute.xlu0 %2137  ;;  %v2083_v0 = vpop.permute.xlu1 %2082  ;;  %v2787_v62 = vcombine.low %v2722_v25, %v2738_v36  ;;  %v2819_v47 = vcombine.low %v2754_v34, %v2770_v5  ;;  %v2788_v60 = vcombine.high %v2722_v25, %v2738_v36  ;;  %v2820_v58 = vcombine.high %v2754_v34, %v2770_v5 }
 0x4bc   : > { %v2323_v1 = vrot.slane %v2315_v13, %v4356_v61  ;;  %v2330_v9 = vrot.slane %v2316_v53, %v4356_v61  ;;  %v2347_v23 = vcombine.low %v2083_v0, %v5043_v46  ;;  %v2348_v39 = vcombine.high %v2083_v0, %v5043_v46 }
 0x4bd   : > { %v5082_v14 = vrot.slane %v2787_v62, %v4365_v10  ;;  %v5085_v3 = vrot.slane %v2819_v47, %v4365_v10  ;;  %v2802_v55 = vrot.slane %v2788_v60, %v4365_v10  ;;  %v2834_v43 = vrot.slane %v2820_v58, %v4365_v10 }
 0x4be   : > { %v2363_v17 = vcombine.low %v2307_v31, %v2323_v1  ;;  %v2364_v59 = vcombine.high %v2307_v31, %v2323_v1  ;;  %v2379_v22 = vcombine.low %v2314_v4, %v2330_v9  ;;  %v2380_v63 = vcombine.high %v2314_v4, %v2330_v9  ;;  %3308 = vrot.lane.b32.xlu1 %v3110_v24, %s4146_s6 }
 0x4bf   : > { %v2355_v2 = vrot.slane %v2347_v23, %v4356_v61  ;;  %v2362_v46 = vrot.slane %v2348_v39, %v4356_v61  ;;  %v2128_v29 = vpop.permute.xlu0 %2127  ;;  %v2840_v32 = vcombine.high %v5082_v14, %v5085_v3  ;;  %v2157_v37 = vpop.permute.xlu1 %2156  ;;  %v2841_v49 = vcombine.low %v2802_v55, %v2834_v43 }
 0x4c0   : > { %v2371_v27 = vrot.slane %v2363_v17, %v4365_v10  ;;  %v2378_v45 = vrot.slane %v2364_v59, %v4365_v10  ;;  %v2387_v30 = vrot.slane %v2379_v22, %v4365_v10  ;;  %v2394_v11 = vrot.slane %v2380_v63, %v4365_v10 }
 0x4c1   : > { %v2395_v33 = vcombine.low %v2339_v40, %v2355_v2  ;;  %v2396_v7 = vcombine.high %v2339_v40, %v2355_v2  ;;  %v2411_v54 = vcombine.low %v2346_v19, %v2362_v46  ;;  %v2412_v42 = vcombine.high %v2346_v19, %v2362_v46  ;;  %3264 = vrot.lane.b32.xlu0 %v2840_v32, %s4113_s7 }
 0x4c2   : > { %v3520_v31 = vcombine.low %v2371_v27, %v2378_v45  ;;  %v3522_v4 = vcombine.high %v2371_v27, %v2378_v45  ;;  %v3524_v12 = vcombine.low %v2387_v30, %v2394_v11  ;;  %v3526_v24 = vcombine.high %v2387_v30, %v2394_v11 }
 0x4c3   : > { %v2403_v57 = vrot.slane %v2395_v33, %v4365_v10  ;;  %v2410_v48 = vrot.slane %v2396_v7, %v4365_v10  ;;  %v2419_v44 = vrot.slane %v2411_v54, %v4365_v10  ;;  %v2426_v15 = vrot.slane %v2412_v42, %v4365_v10  ;;  %v5103_v50 = vpop.permute.xlu0 %2133  ;;  %v2123_v56 = vpop.permute.xlu1 %2122 }
 0x4c4   : > { %v5106_v51 = vrot.slane %v3520_v31, %v4356_v61  ;;  %v5109_v20 = vrot.slane %v3522_v4, %v4356_v61  ;;  %v5112_v16 = vrot.slane %v3524_v12, %v4356_v61  ;;  %v5115_v25 = vrot.slane %v3526_v24, %v4356_v61 }
 0x4c5   : > { %v3521_v36 = vcombine.low %v2403_v57, %v2410_v48  ;;  %v3523_v34 = vcombine.high %v2403_v57, %v2410_v48  ;;  %v3525_v5 = vcombine.low %v2419_v44, %v2426_v15  ;;  %v3527_v40 = vcombine.high %v2419_v44, %v2426_v15  ;;  %3268 = vrot.lane.b32.xlu0 %v2841_v49, %s4128_s10 }
 0x4c6   : > { %v2483_v19 = vcombine.low %v5025_v35, %v2128_v29  ;;  %v2484_v13 = vcombine.high %v5025_v35, %v2128_v29  ;;  %v2125_v53 = vsel %vm2124_vm13, %v5015_v26, %v2123_v56  ;;  %v2842_v0 = vcombine.high %v2802_v55, %v2834_v43 }
 0x4c7   : > { %v5123_v62 = vrot.slane %v3521_v36, %v4356_v61  ;;  %v5126_v47 = vrot.slane %v3523_v34, %v4356_v61  ;;  %v5129_v60 = vrot.slane %v3525_v5, %v4356_v61  ;;  %v5132_v58 = vrot.slane %v3527_v40, %v4356_v61  ;;  %v2155_v1 = vpop.permute.xlu0 %2154  ;;  %v2131_v9 = vpop.permute.xlu1 %2130 }
 0x4c8   : > { %v2491_v35 = vrot.slane %v2483_v19, %v4356_v61  ;;  %v2498_v23 = vrot.slane %v2484_v13, %v4356_v61  ;;  %v2467_v26 = vcombine.low %v5017_v6, %v2125_v53  ;;  %v2468_v39 = vcombine.high %v5017_v6, %v2125_v53 }
 0x4c9   : > { %v2158_v55 = vsel %vm1249_vm8, %v2155_v1, %v2157_v37  ;;  %3272 = vrot.lane.b32.xlu0 %v2842_v0, %s4146_s6  ;;  %v2907_v43 = vcombine.low %v5106_v51, %v5109_v20  ;;  %v2939_v17 = vcombine.low %v5112_v16, %v5115_v25  ;;  %v2923_v59 = vcombine.low %v5123_v62, %v5126_v47 }
 0x4ca   : > { %v2475_v22 = vrot.slane %v2467_v26, %v4356_v61  ;;  %v2482_v63 = vrot.slane %v2468_v39, %v4356_v61  ;;  %v2955_v6 = vcombine.low %v5129_v60, %v5132_v58  ;;  %v2908_v2 = vcombine.high %v5106_v51, %v5109_v20 }
 0x4cb   : > { %v2148_v46 = vpop.permute.xlu0 %2147  ;;  %v5153_v29 = vrot.slane %v2907_v43, %v4365_v10  ;;  %v5156_v32 = vrot.slane %v2939_v17, %v4365_v10  ;;  %v2140_v37 = vpop.permute.xlu1 %2139  ;;  %v5159_v49 = vrot.slane %v2923_v59, %v4365_v10  ;;  %v2940_v27 = vcombine.high %v5112_v16, %v5115_v25 }
 0x4cc   : > { %v2531_v45 = vcombine.low %v2475_v22, %v2491_v35  ;;  %v2532_v30 = vcombine.high %v2475_v22, %v2491_v35  ;;  %v2547_v11 = vcombine.low %v2482_v63, %v2498_v23  ;;  %v2548_v33 = vcombine.high %v2482_v63, %v2498_v23 }
 0x4cd   : > { %v2603_v7 = vcombine.low %v2148_v46, %v2158_v55  ;;  %v2604_v54 = vcombine.high %v2148_v46, %v2158_v55  ;;  %v2972_v42 = vcombine.high %v5153_v29, %v5156_v32  ;;  %v2142_v31 = vsel %vm2141_vm14, %v5075_v52, %v2140_v37 }
 0x4ce   : > { %v2539_v4 = vrot.slane %v2531_v45, %v4365_v10  ;;  %v2546_v12 = vrot.slane %v2532_v30, %v4365_v10  ;;  %v2555_v24 = vrot.slane %v2547_v11, %v4365_v10  ;;  %v2562_v57 = vrot.slane %v2548_v33, %v4365_v10 }
 0x4cf   : > { %v2611_v48 = vrot.slane %v2603_v7, %v4356_v61  ;;  %v2618_v44 = vrot.slane %v2604_v54, %v4356_v61  ;;  %3276 = vrot.lane.b32.xlu1 %v2972_v42, %s4113_s7  ;;  %v2571_v15 = vcombine.low %v2131_v9, %v2142_v31  ;;  %v2572_v56 = vcombine.high %v2131_v9, %v2142_v31  ;;  %v2145_v51 = vpop.permute.xlu1 %2144  ;;  %v2161_v9 = vpop.permute.xlu0 %2160 }
 0x4d0   : > { %v3529_v20 = vcombine.low %v2539_v4, %v2546_v12  ;;  %v3531_v16 = vcombine.high %v2539_v4, %v2546_v12  ;;  %v3533_v52 = vcombine.low %v2555_v24, %v2562_v57  ;;  %v3535_v25 = vcombine.high %v2555_v24, %v2562_v57 }
 0x4d1   : > { %v2579_v36 = vrot.slane %v2571_v15, %v4356_v61  ;;  %v2586_v34 = vrot.slane %v2572_v56, %v4356_v61  ;;  %v5177_v5 = vrot.slane %v2955_v6, %v4365_v10  ;;  %v2922_v40 = vrot.slane %v2908_v2, %v4365_v10 }
 0x4d2   : > { %v5181_v19 = vrot.slane %v3529_v20, %v4356_v61  ;;  %v5184_v13 = vrot.slane %v3531_v16, %v4356_v61  ;;  %v5187_v53 = vrot.slane %v3533_v52, %v4356_v61  ;;  %v5190_v0 = vrot.slane %v3535_v25, %v4356_v61 }
 0x4d3   : > { %v2976_v1 = vcombine.high %v5159_v49, %v5177_v5  ;;  %v2954_v35 = vrot.slane %v2940_v27, %v4365_v10  ;;  %v2587_v23 = vcombine.low %v5103_v50, %v2145_v51  ;;  %v2588_v26 = vcombine.high %v5103_v50, %v2145_v51  ;;  %v2151_v39 = vpop.permute.xlu1 %2150 }
 0x4d4   : > { %v2924_v55 = vcombine.high %v5123_v62, %v5126_v47  ;;  %v2956_v43 = vcombine.high %v5129_v60, %v5132_v58  ;;  %v2619_v17 = vcombine.low %v2151_v39, %v2161_v9  ;;  %v2620_v59 = vcombine.high %v2151_v39, %v2161_v9 }
 0x4d5   : > { %3288 = vrot.lane.b32.xlu0 %v2976_v1, %s4113_s7  ;;  %v2973_v22 = vcombine.low %v2922_v40, %v2954_v35  ;;  %v2595_v63 = vrot.slane %v2587_v23, %v4356_v61  ;;  %v2602_v6 = vrot.slane %v2588_v26, %v4356_v61  ;;  %v2974_v2 = vcombine.high %v2922_v40, %v2954_v35 }
 0x4d6   : > { %v2938_v46 = vrot.slane %v2924_v55, %v4365_v10  ;;  %v2970_v50 = vrot.slane %v2956_v43, %v4365_v10  ;;  %v2627_v37 = vrot.slane %v2619_v17, %v4356_v61  ;;  %v2634_v62 = vrot.slane %v2620_v59, %v4356_v61 }
 0x4d7   : > { %3280 = vrot.lane.b32.xlu1 %v2973_v22, %s4128_s10  ;;  %v2635_v47 = vcombine.low %v2579_v36, %v2595_v63  ;;  %v2636_v60 = vcombine.high %v2579_v36, %v2595_v63  ;;  %v2651_v58 = vcombine.low %v2586_v34, %v2602_v6  ;;  %v2652_v27 = vcombine.high %v2586_v34, %v2602_v6 }
 0x4d8   : > { %v2977_v45 = vcombine.low %v2938_v46, %v2970_v50  ;;  %v2667_v30 = vcombine.low %v2611_v48, %v2627_v37  ;;  %v2668_v11 = vcombine.high %v2611_v48, %v2627_v37  ;;  %v2683_v33 = vcombine.low %v2618_v44, %v2634_v62 }
 0x4d9   : > { %v2643_v7 = vrot.slane %v2635_v47, %v4365_v10  ;;  %v2650_v54 = vrot.slane %v2636_v60, %v4365_v10  ;;  %v2659_v42 = vrot.slane %v2651_v58, %v4365_v10  ;;  %v2666_v31 = vrot.slane %v2652_v27, %v4365_v10 }
 0x4da   : > { %3292 = vrot.lane.b32.xlu0 %v2977_v45, %s4128_s10  ;;  %v2675_v4 = vrot.slane %v2667_v30, %v4365_v10  ;;  %v2682_v12 = vrot.slane %v2668_v11, %v4365_v10  ;;  %v2684_v24 = vcombine.high %v2618_v44, %v2634_v62  ;;  %v2691_v57 = vrot.slane %v2683_v33, %v4365_v10 }
 0x4db   : > { %v3536_v15 = vcombine.low %v2643_v7, %v2650_v54  ;;  %v3538_v48 = vcombine.high %v2643_v7, %v2650_v54  ;;  %v3540_v56 = vcombine.low %v2659_v42, %v2666_v31  ;;  %v3542_v51 = vcombine.high %v2659_v42, %v2666_v31  ;;  %3284 = vrot.lane.b32.xlu1 %v2974_v2, %s4146_s6 }
 0x4dc   : > { %v2698_v20 = vrot.slane %v2684_v24, %v4365_v10  ;;  %v3537_v16 = vcombine.low %v2675_v4, %v2682_v12  ;;  %v3539_v52 = vcombine.high %v2675_v4, %v2682_v12  ;;  %v2978_v25 = vcombine.high %v2938_v46, %v2970_v50 }
 0x4dd   : > { %v3123_v36 = vrot.slane %v3536_v15, %v4356_v61  ;;  %v3139_v34 = vrot.slane %v3538_v48, %v4356_v61  ;;  %v3155_v40 = vrot.slane %v3540_v56, %v4356_v61  ;;  %v3171_v44 = vrot.slane %v3542_v51, %v4356_v61 }
 0x4de   : > { %v3130_v1 = vrot.slane %v3537_v16, %v4356_v61  ;;  %v3146_v9 = vrot.slane %v3539_v52, %v4356_v61  ;;  %v3541_v35 = vcombine.low %v2691_v57, %v2698_v20  ;;  %v3543_v23 = vcombine.high %v2691_v57, %v2698_v20  ;;  %3296 = vrot.lane.b32.xlu0 %v2978_v25, %s4146_s6 }
 0x4df   : > { %v3059_v26 = vcombine.low %v5181_v19, %v5184_v13  ;;  %v3091_v39 = vcombine.low %v5187_v53, %v5190_v0  ;;  %v3060_v55 = vcombine.high %v5181_v19, %v5184_v13  ;;  %v3092_v43 = vcombine.high %v5187_v53, %v5190_v0 }
 0x4e0   : > { %v3162_v17 = vrot.slane %v3541_v35, %v4356_v61  ;;  %v3178_v59 = vrot.slane %v3543_v23, %v4356_v61  ;;  %v3179_v22 = vcombine.low %v3123_v36, %v3139_v34  ;;  %v3211_v63 = vcombine.low %v3155_v40, %v3171_v44 }
 0x4e1   : > { %v5237_v6 = vrot.slane %v3059_v26, %v4365_v10  ;;  %v5240_v2 = vrot.slane %v3091_v39, %v4365_v10  ;;  %v3180_v13 = vcombine.high %v3123_v36, %v3139_v34  ;;  %v3212_v53 = vcombine.high %v3155_v40, %v3171_v44 }
 0x4e2   : > { %v5243_v46 = vrot.slane %v3179_v22, %v4365_v10  ;;  %v5246_v19 = vrot.slane %v3211_v63, %v4365_v10  ;;  %v3074_v61 = vrot.slane %v3060_v55, %v4365_v10  ;;  %v3106_v50 = vrot.slane %v3092_v43, %v4365_v10 }
 0x4e3   : > { %v3112_v0 = vcombine.high %v5237_v6, %v5240_v2  ;;  %v3195_v37 = vcombine.low %v3130_v1, %v3146_v9  ;;  %v3194_v47 = vrot.slane %v3180_v13, %v4365_v10  ;;  %v3226_v60 = vrot.slane %v3212_v53, %v4365_v10 }
 0x4e4   : > { %v3244_v62 = vcombine.high %v5243_v46, %v5246_v19  ;;  %v3227_v58 = vcombine.low %v3162_v17, %v3178_v59  ;;  %v2839_v45 = vcombine.low %v5082_v14, %v5085_v3  ;;  %v2971_v11 = vcombine.low %v5153_v29, %v5156_v32 }
 0x4e5   : > { %3312 = vrot.lane.b32.xlu0 %v3112_v0, %s4113_s7  ;;  %v5258_v27 = vrot.slane %v3195_v37, %v4365_v10  ;;  %v3113_v33 = vcombine.low %v3074_v61, %v3106_v50  ;;  %v2975_v7 = vcombine.low %v5159_v49, %v5177_v5  ;;  %v3111_v54 = vcombine.low %v5237_v6, %v5240_v2 }
 0x4e6   : > { %3324 = vrot.lane.b32.xlu1 %v3244_v62, %s4113_s7  ;;  %v5264_v30 = vrot.slane %v3227_v58, %v4365_v10  ;;  %v3245_v42 = vcombine.low %v3194_v47, %v3226_v60  ;;  %v3243_v31 = vcombine.low %v5243_v46, %v5246_v19  ;;  %v3114_v3 = vcombine.high %v3074_v61, %v3106_v50 }
 0x4e7   : > { %v3196_v29 = vcombine.high %v3130_v1, %v3146_v9  ;;  %v3228_v32 = vcombine.high %v3162_v17, %v3178_v59  ;;  %v3246_v49 = vcombine.high %v3194_v47, %v3226_v60  ;;  %vm3349_vm8 = vcmask 785408  }
 0x4e8   : > { %v3247_v14 = vcombine.low %v5258_v27, %v5264_v30  ;;  %v3248_v5 = vcombine.high %v5258_v27, %v5264_v30 }
 0x4e9   : > { %3316 = vrot.lane.b32.xlu0 %v3113_v33, %s4128_s10  ;;  %v3210_v4 = vrot.slane %v3196_v29, %v4365_v10  ;;  %v3242_v12 = vrot.slane %v3228_v32, %v4365_v10 }
 0x4ea   : > { %3328 = vrot.lane.b32.xlu1 %v3245_v42, %s4128_s10 }
 0x4eb   : > { %v3249_v24 = vcombine.low %v3210_v4, %v3242_v12  ;;  %v3250_v57 = vcombine.high %v3210_v4, %v3242_v12 }
 0x4ed   : > { %3320 = vrot.lane.b32.xlu0 %v3114_v3, %s4146_s6 }
 0x4ee   : > { %3332 = vrot.lane.b32.xlu1 %v3246_v49, %s4146_s6 }
 0x4f1   : > { %3336 = vrot.lane.b32.xlu0 %v3248_v5, %s4113_s7  ;;  %s5296_s7 = scalar_lea.vmem [#allocation2], %s3458_s13 }
 0x4f5   : > { %3340 = vrot.lane.b32.xlu0 %v3249_v24, %s4128_s10  ;;  %s3550_s10 = sshll.u32 %s4217_s22, 10  ;;  %s3381_s22 = scalar_lea.sflag [#allocation3], %s215_s12 }
 0x4f6   : > { %s5342_s23 = scalar_lea.hbm %s5393_s5, %s3550_s10 }
 0x4f9   : > { %3344 = vrot.lane.b32.xlu0 %v3250_v57, %s4146_s6  ;;  %s3395_s6 = sshll.u32 %s5296_s7, 4  ;;  %s5344_s6 = int_to_ptr.vmem [resolvable:$true] %s3395_s6 }
 0x4fa   : > { %s4029_s9 = scalar_lea.vmem %s5344_s6, 1024  ;;  %p4036_p0 = scmp.lt.s32.totalorder %s5344_s6, %s4034_s30 }
 0x4fb   : > { %p4030_p11 = scmp.ne.s32.totalorder %s5344_s6, %s4029_s9  ;;  %p4037_p1 = scmp.lt.s32.totalorder %s4035_s11, %s4029_s9 }
 0x4fd   : > { %p4031_p12 = pnand %p4030_p11, %p4234_p5  ;;  %p4038_p2 = por %p4037_p1, %p4036_p0 }
 0x4ff   : > { %p4032_p13 = pneg %p4031_p12 }
 0x501   : > { %v3253_v15 = vpop.permute.xlu1 %3252  ;;  %p4039_p3 = pnand %p4038_p2, %p4032_p13 }
 0x502   : > { %v3347_v56 = vsel %vm1213_vm4, %v2835_v38, %v3253_v15 }
 0x505   : > { %v3257_v48 = vpop.permute.xlu1 %3256 }
 0x506   : > { %v3348_v10 = vsel %vm1245_vm6, %v3347_v56, %v3257_v48 }
 0x509   : > { %v3261_v51 = vpop.permute.xlu1 %3260 }
 0x50a   : > { %v3350_v20 = vsel %vm3349_vm8, %v3348_v10, %v3261_v51 }
 0x50b   : > { %3372 = vst [vmem:[%s5296_s7] sm:$0xff] %v3350_v20 }
 0x528   : > { %v3301_v16 = vpop.permute.xlu1 %3300 }
 0x529   : > { %v3360_v18 = vsel %vm1213_vm4, %v3107_v41, %v3301_v16 }
 0x52c   : > { %v3305_v52 = vpop.permute.xlu1 %3304 }
 0x52d   : > { %v3361_v8 = vsel %vm1245_vm6, %v3360_v18, %v3305_v52 }
 0x530   : > { %v3309_v38 = vpop.permute.xlu1 %3308 }
 0x531   : > { %v3362_v25 = vsel %vm3349_vm8, %v3361_v8, %v3309_v38 }
 0x532   : > { %3376 = vst [vmem:[%s5296_s7 + $0x20] sm:$0xff] %v3362_v25 }
 0x533   : > { %v3265_v36 = vpop.permute.xlu0 %3264 }
 0x534   : > { %v3351_v40 = vsel %vm1213_vm4, %v2839_v45, %v3265_v36 }
 0x537   : > { %v3269_v34 = vpop.permute.xlu0 %3268 }
 0x538   : > { %v3352_v44 = vsel %vm1245_vm6, %v3351_v40, %v3269_v34 }
 0x53b   : > { %v3273_v1 = vpop.permute.xlu0 %3272 }
 0x53c   : > { %v3353_v9 = vsel %vm3349_vm8, %v3352_v44, %v3273_v1 }
 0x53d   : > { %3373 = vst [vmem:[%s5296_s7 + $0x8] sm:$0xff] %v3353_v9 }
 0x541   : > { %v3277_v28 = vpop.permute.xlu1 %3276 }
 0x542   : > { %v3354_v35 = vsel %vm1213_vm4, %v2971_v11, %v3277_v28 }
 0x547   : > { %v3289_v21 = vpop.permute.xlu0 %3288 }
 0x548   : > { %v3357_v43 = vsel %vm1213_vm4, %v2975_v7, %v3289_v21 }
 0x549   : > { %v3281_v41 = vpop.permute.xlu1 %3280 }
 0x54a   : > { %v3355_v26 = vsel %vm1245_vm6, %v3354_v35, %v3281_v41 }
 0x54c   : > { %v3293_v23 = vpop.permute.xlu0 %3292 }
 0x54d   : > { %v3285_v39 = vpop.permute.xlu1 %3284  ;;  %v3358_v17 = vsel %vm1245_vm6, %v3357_v43, %v3293_v23 }
 0x54e   : > { %v3356_v55 = vsel %vm3349_vm8, %v3355_v26, %v3285_v39 }
 0x54f   : > { %3374 = vst [vmem:[%s5296_s7 + $0x10] sm:$0xff] %v3356_v55 }
 0x550   : > { %v3297_v59 = vpop.permute.xlu0 %3296 }
 0x551   : > { %v3359_v22 = vsel %vm3349_vm8, %v3358_v17, %v3297_v59 }
 0x552   : > { %3375 = vst [vmem:[%s5296_s7 + $0x18] sm:$0xff] %v3359_v22 }
 0x557   : > { %v3313_v63 = vpop.permute.xlu0 %3312 }
 0x558   : > { %v3325_v13 = vpop.permute.xlu1 %3324  ;;  %v3363_v61 = vsel %vm1213_vm4, %v3111_v54, %v3313_v63 }
 0x559   : > { %v3366_v62 = vsel %vm1213_vm4, %v3243_v31, %v3325_v13 }
 0x55b   : > { %v3317_v53 = vpop.permute.xlu0 %3316 }
 0x55c   : > { %v3329_v0 = vpop.permute.xlu1 %3328  ;;  %v3364_v50 = vsel %vm1245_vm6, %v3363_v61, %v3317_v53 }
 0x55d   : > { %v3367_v60 = vsel %vm1245_vm6, %v3366_v62, %v3329_v0 }
 0x55f   : > { %v3321_v37 = vpop.permute.xlu0 %3320 }
 0x560   : > { %v3365_v47 = vsel %vm3349_vm8, %v3364_v50, %v3321_v37  ;;  %v3333_v58 = vpop.permute.xlu1 %3332 }
 0x561   : > { %3377 = vst [vmem:[%s5296_s7 + $0x28] sm:$0xff] %v3365_v47  ;;  %v3368_v6 = vsel %vm3349_vm8, %v3367_v60, %v3333_v58 }
 0x562   : > { %3378 = vst [vmem:[%s5296_s7 + $0x30] sm:$0xff] %v3368_v6 }
 0x563   : > { %v3337_v2 = vpop.permute.xlu0 %3336 }
 0x564   : > { %v3369_v46 = vsel %vm1213_vm4, %v3247_v14, %v3337_v2 }
 0x567   : > { %v3341_v45 = vpop.permute.xlu0 %3340 }
 0x568   : > { %v3370_v19 = vsel %vm1245_vm6, %v3369_v46, %v3341_v45 }
 0x56b   : > { %v3345_v11 = vpop.permute.xlu0 %3344 }
 0x56c   : > { %v3371_v33 = vsel %vm3349_vm8, %v3370_v19, %v3345_v11 }
 0x56d   : > { %3379 = vst [vmem:[%s5296_s7 + $0x38] sm:$0xff] %v3371_v33 }
 0x56e   : > { %4042 = shalt.err (!%p4039_p3)
}
 0x56f   : > { %s4043_s8 = scalar_lea.hbm %s5342_s23, 1024  ;;  %s4047_s15 = scalar_lea.hbm %s5393_s5, 2048 }
 0x570   : > { %p4044_p4 = scmp.ne.s32.totalorder %s5342_s23, %s4043_s8  ;;  %p4048_p9 = scmp.lt.u32.totalorder %s5342_s23, %s5393_s5 }
 0x571   : > { %p4049_p10 = scmp.lt.u32.totalorder %s4047_s15, %s4043_s8  ;;  %p4051_p12 = scmp.lt.u32.totalorder %s4043_s8, %s5342_s23 }
 0x572   : > { %p4045_p7 = pnand %p4044_p4, %p4234_p5 }
 0x573   : > { %p4050_p11 = por %p4049_p10, %p4048_p9 }
 0x574   : > { %p4046_p8 = pneg %p4045_p7 }
 0x575   : > { %p4052_p13 = por %p4051_p12, %p4050_p11 }
 0x577   : > { %p4053_p0 = pnand %p4052_p13, %p4046_p8 }
 0x579   : > { %4056 = shalt.err (!%p4053_p0)
}
 0x57a   : > { %3754 = dma.vmem_to_hbm [thread:$0]  (%p4234_p5), %s5344_s6, 1024, %s5342_s23, %s3381_s22  }
 0x57b PF: > { %p3760_p1 = scmp.ge.s32.totalorder %s4091_s21, 2  ;;  %s3407_s7 = sand.u32 1, %s4079_s18  }
 0x57c   : > { %s3408_s10 = scalar_lea.sflag [#allocation3], %s3407_s7 }
 0x57d   : > { %p3757_p2 = pnand %p3760_p1, %p4238_p6 }
 0x57f   : > { %4074 = dma.done.wait (!%p3757_p2), %s3408_s10, 1024  }
 0x580   : > { %4076 = vsyncadd (!%p3757_p2), %s3408_s10, 4294966272  ;;  %p15_p3 = scmp.ge.s32.totalorder %s4221_s24, 4   ;;  %s5401_s18 = smov %s4083_s19 }
 0x581   : > { %s5402_s19 = smov %s4087_s20  ;;  %s5403_s20 = smov %s4232_s27 }
 0x582   : > { %s5404_s21 = smov %s4221_s24  ;;  %17 = sbr.rel (!%p15_p3) target bundleno = 3 (0x3), region = 75 }
 0x589   :  { %3413 = vsyncpa [#allocation3], 1 }
 0x58a   :  { %3415 = vsyncpa [#allocation3 + $0x1], 1 }

</bundles_post_ra>
